<compile_context>
chip_gen: v7x
topology: tpu7x:2x2x1
jax: 0.10.0
libtpu: 0.0.40
codegen_flags: <defaults>
</compile_context>

<pallas_src>
import functools
import math

import jax
import jax.numpy as jnp
from jax import lax
from jax.experimental import pallas as pl
from jax.experimental.pallas import tpu as pltpu


# ----------------------------------------------------------------------------
# helpers
# ----------------------------------------------------------------------------
def _layernorm(x, gamma, beta, eps=1e-5):
    """LayerNorm over the last dim. x: (..., E), gamma/beta broadcastable."""
    mu = jnp.mean(x, axis=-1, keepdims=True)
    xc = x - mu
    var = jnp.mean(xc * xc, axis=-1, keepdims=True)
    return xc * lax.rsqrt(var + eps) * gamma + beta


_COMPILER_PARAMS = pltpu.CompilerParams(
    dimension_semantics=("arbitrary",),          # grid=(1,): single fused step
    vmem_limit_bytes=48 * 1024 * 1024,           # safe for v7x's 64 MiB VMEM
)


# ----------------------------------------------------------------------------
# Fused full-layer kernel
# ----------------------------------------------------------------------------
def _fused_layer_kernel(*refs, nhead, batch, use_pos, activation):
    if use_pos:
        (src_ref, pos_ref, ln1_g, ln1_b, ln2_g, ln2_b,
         wqkv_ref, wo_ref, w1_ref, b1_ref, w2_ref, b2_ref, o_ref) = refs
    else:
        (src_ref, ln1_g, ln1_b, ln2_g, ln2_b,
         wqkv_ref, wo_ref, w1_ref, b1_ref, w2_ref, b2_ref, o_ref) = refs
        pos_ref = None

    x = src_ref[...].astype(jnp.float32)            # (M, E), M = L*B (row = l*B + b)
    M, E = x.shape
    dh = E // nhead

    # ---- norm1 + fused QKV projection (single MXU pass, 3E lane-dense cols) ----
    x2 = _layernorm(x, ln1_g[...], ln1_b[...])
    if pos_ref is None:
        qkv = jnp.dot(x2.astype(jnp.bfloat16), wqkv_ref[...],
                      preferred_element_type=jnp.float32)               # (M, 3E)
        q, k, v = qkv[:, :E], qkv[:, E:2 * E], qkv[:, 2 * E:]
    else:
        qk_in = (x2 + pos_ref[...].astype(jnp.float32)).astype(jnp.bfloat16)
        qk = jnp.dot(qk_in, wqkv_ref[:, :2 * E],
                     preferred_element_type=jnp.float32)                # (M, 2E)
        v = jnp.dot(x2.astype(jnp.bfloat16), wqkv_ref[:, 2 * E:],
                    preferred_element_type=jnp.float32)                 # (M, E)
        q, k = qk[:, :E], qk[:, E:]

    # cast once; 1/sqrt(dh) already folded into the Wq columns at param prep.
    q_b = q.astype(jnp.bfloat16)
    k_b = k.astype(jnp.bfloat16)
    v_b = v.astype(jnp.bfloat16)

    # additive mask blocking cross-batch attention (interleaved rows: batch = r % B)
    row_b = lax.broadcasted_iota(jnp.int32, (M, M), 0) % batch
    col_b = lax.broadcasted_iota(jnp.int32, (M, M), 1) % batch
    neg_mask = jnp.where(row_b == col_b, 0.0, -1e30).astype(jnp.float32)

    # ---- per-head softmax(Q K^T) V; heads collected into one (M, E) slab ----
    heads = []
    for h in range(nhead):
        lo = h * dh
        qh = q_b[:, lo:lo + dh]
        kh = k_b[:, lo:lo + dh]
        vh = v_b[:, lo:lo + dh]

        s = jnp.einsum("qd,kd->qk", qh, kh,
                       preferred_element_type=jnp.float32) + neg_mask   # (M, M)
        s = s - jnp.max(s, axis=-1, keepdims=True)
        p = jnp.exp(s)                                                   # EUP
        p = p * pl.reciprocal(jnp.sum(p, axis=-1, keepdims=True), approx=True)

        heads.append(jnp.dot(p.astype(jnp.bfloat16), vh,
                             preferred_element_type=jnp.float32))        # (M, dh)

    attn = jnp.concatenate(heads, axis=-1).astype(jnp.bfloat16)          # (M, E)

    # single full-width (K=E) output projection, then residual
    src1 = x + jnp.dot(attn, wo_ref[...], preferred_element_type=jnp.float32)

    # ---- norm2 + FFN + residual (hidden layer never leaves VMEM) ----
    x3 = _layernorm(src1, ln2_g[...], ln2_b[...])
    hdn = jnp.dot(x3.astype(jnp.bfloat16), w1_ref[...],
                  preferred_element_type=jnp.float32) + b1_ref[...]      # (M, F)
    if activation == "relu":
        hdn = jnp.maximum(hdn, 0.0)
    elif activation == "gelu":
        hdn = jax.nn.gelu(hdn, approximate=False)
    else:
        raise ValueError(f"unsupported activation: {activation}")

    y = jnp.dot(hdn.astype(jnp.bfloat16), w2_ref[...],
                preferred_element_type=jnp.float32) + b2_ref[...]        # (M, E)
    o_ref[...] = (src1 + y).astype(o_ref.dtype)


# ----------------------------------------------------------------------------
# Full layer forward (matches the PyTorch reference, inference mode)
# ----------------------------------------------------------------------------
def transformer_encoder_layer_forward(params, src, pos=None,
                                      nhead=4, activation="relu"):
    """src: (L, B, E)  (PyTorch seq-first layout).  Returns (L, B, E)."""
    L, B, E = src.shape
    M = L * B
    F = params["w1_t"].shape[1]
    use_pos = pos is not None

    # contiguous reshape only (no transpose): row index r = l*B + b
    src_rows = src.reshape(M, E)
    inputs = [src_rows]
    if use_pos:
        inputs.append(pos.reshape(M, E))
    inputs += [params["ln1_g"], params["ln1_b"],
               params["ln2_g"], params["ln2_b"],
               params["wqkv_t"], params["wo_t"],
               params["w1_t"], params["b1"], params["w2_t"], params["b2"]]

    def full(shape):
        return pl.BlockSpec(shape, lambda i, _s=shape: tuple(0 for _ in _s))

    in_specs = [full((M, E))] + ([full((M, E))] if use_pos else []) + [
        full((1, E)), full((1, E)), full((1, E)), full((1, E)),
        full((E, 3 * E)), full((E, E)),
        full((E, F)), full((1, F)), full((F, E)), full((1, E)),
    ]

    kernel = functools.partial(_fused_layer_kernel, nhead=nhead, batch=B,
                               use_pos=use_pos, activation=activation)

    out = pl.pallas_call(
        kernel,
        out_shape=jax.ShapeDtypeStruct((M, E), jnp.float32),
        grid_spec=pltpu.PrefetchScalarGridSpec(
            num_scalar_prefetch=0,
            grid=(1,),
            in_specs=in_specs,
            out_specs=full((M, E)),
        ),
        compiler_params=_COMPILER_PARAMS,
    )(*inputs)
    return out.reshape(L, B, E)


# ----------------------------------------------------------------------------
# Parameters (deterministic synthetic), stored pre-transposed for x @ W^T
# ----------------------------------------------------------------------------
def init_params(key, d_model, dim_feedforward):
    E, F = d_model, dim_feedforward
    ks = jax.random.split(key, 12)

    def w(k, shape, fan_in):
        return jax.random.normal(k, shape, jnp.float32) * (1.0 / math.sqrt(fan_in))

    return dict(
        # MultiheadAttention(bias=False): in_proj (q/k/v) and out_proj, no biases
        wq_t=w(ks[0], (E, E), E), wk_t=w(ks[1], (E, E), E),
        wv_t=w(ks[2], (E, E), E), wo_t=w(ks[3], (E, E), E),
        # linear1 / linear2 (with biases)
        w1_t=w(ks[4], (E, F), E), b1=w(ks[5], (1, F), E),
        w2_t=w(ks[6], (F, E), F), b2=w(ks[7], (1, E), F),
        # LayerNorm affine params
        ln1_g=1.0 + 0.1 * jax.random.normal(ks[8], (1, E), jnp.float32),
        ln1_b=0.1 * jax.random.normal(ks[9], (1, E), jnp.float32),
        ln2_g=1.0 + 0.1 * jax.random.normal(ks[10], (1, E), jnp.float32),
        ln2_b=0.1 * jax.random.normal(ks[11], (1, E), jnp.float32),
    )


def prepare_device_params(params, nhead):
    """One-time offline transform: concat Wq|Wk|Wv (scale folded into Wq),
    cast MXU weights to bf16.  LayerNorm / bias params stay f32."""
    E = params["wq_t"].shape[0]
    scale = 1.0 / math.sqrt(E // nhead)
    wqkv = jnp.concatenate(
        [params["wq_t"] * scale, params["wk_t"], params["wv_t"]], axis=1)

    dev = {k: v for k, v in params.items() if k not in ("wq_t", "wk_t", "wv_t")}
    dev["wqkv_t"] = wqkv.astype(jnp.bfloat16)
    for k in ("wo_t", "w1_t", "w2_t"):
        dev[k] = params[k].astype(jnp.bfloat16)
    return dev


# ----------------------------------------------------------------------------
# Pure-JAX f32 reference (sanity check against the bf16 kernel)
# ----------------------------------------------------------------------------
def reference_forward(params, src, pos=None, nhead=4, activation="relu"):
    L, B, E = src.shape
    dh = E // nhead

    x2 = _layernorm(src, params["ln1_g"][0], params["ln1_b"][0])
    qk = x2 if pos is None else x2 + pos
    q = qk @ params["wq_t"]
    k = qk @ params["wk_t"]
    v = x2 @ params["wv_t"]

    def split(t):  # (L, B, E) -> (B, H, L, dh)
        return jnp.transpose(t.reshape(L, B, nhead, dh), (1, 2, 0, 3))

    qh, kh, vh = split(q), split(k), split(v)
    s = jnp.einsum("bhqd,bhkd->bhqk", qh, kh) / math.sqrt(dh)
    p = jax.nn.softmax(s, axis=-1)
    o = jnp.einsum("bhqk,bhkd->bhqd", p, vh)
    o = jnp.transpose(o, (2, 0, 1, 3)).reshape(L, B, E)
    src = src + o @ params["wo_t"]

    x2 = _layernorm(src, params["ln2_g"][0], params["ln2_b"][0])
    h = x2 @ params["w1_t"] + params["b1"][0]
    h = jnp.maximum(h, 0.0) if activation == "relu" else jax.nn.gelu(h, approximate=False)
    return src + h @ params["w2_t"] + params["b2"][0]


# ----------------------------------------------------------------------------
# main
# ----------------------------------------------------------------------------
if __name__ == "__main__":
    SEQ, BATCH = 8, 2
    D_MODEL, NHEAD, DIM_FF = 128, 4, 256

    key = jax.random.PRNGKey(0)
    k_src, k_par = jax.random.split(key)
    src = jax.random.normal(k_src, (SEQ, BATCH, D_MODEL), jnp.float32)
    params = init_params(k_par, D_MODEL, DIM_FF)
    dev_params = prepare_device_params(params, NHEAD)

    fwd = jax.jit(functools.partial(transformer_encoder_layer_forward,
                                    nhead=NHEAD, activation="relu"))
    out = fwd(dev_params, src)
    jax.block_until_ready(out)

    assert out.shape == (SEQ, BATCH, D_MODEL)
    assert bool(jnp.all(jnp.isfinite(out)))

    # sanity-check against the f32 pure-JAX reference (loose tol: bf16 MXU inputs)
    ref = reference_forward(params, src, nhead=NHEAD, activation="relu")
    abs_err = jnp.abs(out - ref)
    assert float(jnp.max(abs_err)) < 0.3, float(jnp.max(abs_err))
    assert float(jnp.mean(abs_err)) < 0.06, float(jnp.mean(abs_err))

    print("KERNEL_OK")
</pallas_src>

<mosaic_0001>
module attributes {stable_mosaic.version = 11 : i64} {
  func.func @_fused_layer_kernel(%arg0: i32, %arg1: memref<16x128xf32, #tpu.memory_space<vmem>>, %arg2: memref<1x128xf32, #tpu.memory_space<vmem>>, %arg3: memref<1x128xf32, #tpu.memory_space<vmem>>, %arg4: memref<1x128xf32, #tpu.memory_space<vmem>>, %arg5: memref<1x128xf32, #tpu.memory_space<vmem>>, %arg6: memref<128x384xbf16, #tpu.memory_space<vmem>>, %arg7: memref<128x128xbf16, #tpu.memory_space<vmem>>, %arg8: memref<128x256xbf16, #tpu.memory_space<vmem>>, %arg9: memref<1x256xf32, #tpu.memory_space<vmem>>, %arg10: memref<256x128xbf16, #tpu.memory_space<vmem>>, %arg11: memref<1x128xf32, #tpu.memory_space<vmem>>, %arg12: memref<16x128xf32, #tpu.memory_space<vmem>>) attributes {dimension_semantics = [#tpu.dimension_semantics<arbitrary>], iteration_bounds = array<i64: 1>, scalar_prefetch = 0 : i64, scratch_operands = 0 : i64, tpu.core_type = #tpu.core_type<tc>, window_params = [{pipeline_mode = #tpu.pipeline_mode<synchronous>, transform_indices = @transform_0, window_bounds = array<i64: 16, 128>}, {pipeline_mode = #tpu.pipeline_mode<synchronous>, transform_indices = @transform_1, window_bounds = array<i64: 1, 128>}, {pipeline_mode = #tpu.pipeline_mode<synchronous>, transform_indices = @transform_2, window_bounds = array<i64: 1, 128>}, {pipeline_mode = #tpu.pipeline_mode<synchronous>, transform_indices = @transform_3, window_bounds = array<i64: 1, 128>}, {pipeline_mode = #tpu.pipeline_mode<synchronous>, transform_indices = @transform_4, window_bounds = array<i64: 1, 128>}, {pipeline_mode = #tpu.pipeline_mode<synchronous>, transform_indices = @transform_5, window_bounds = array<i64: 128, 384>}, {pipeline_mode = #tpu.pipeline_mode<synchronous>, transform_indices = @transform_6, window_bounds = array<i64: 128, 128>}, {pipeline_mode = #tpu.pipeline_mode<synchronous>, transform_indices = @transform_7, window_bounds = array<i64: 128, 256>}, {pipeline_mode = #tpu.pipeline_mode<synchronous>, transform_indices = @transform_8, window_bounds = array<i64: 1, 256>}, {pipeline_mode = #tpu.pipeline_mode<synchronous>, transform_indices = @transform_9, window_bounds = array<i64: 256, 128>}, {pipeline_mode = #tpu.pipeline_mode<synchronous>, transform_indices = @transform_10, window_bounds = array<i64: 1, 128>}, {pipeline_mode = #tpu.pipeline_mode<synchronous>, transform_indices = @transform_11, window_bounds = array<i64: 16, 128>}]} {
    %c0 = arith.constant 0 : index
    %c0_0 = arith.constant 0 : index
    %0 = vector.load %arg1[%c0, %c0_0] : memref<16x128xf32, #tpu.memory_space<vmem>>, vector<16x128xf32>
    %c0_1 = arith.constant 0 : index
    %c0_2 = arith.constant 0 : index
    %1 = vector.load %arg2[%c0_1, %c0_2] : memref<1x128xf32, #tpu.memory_space<vmem>>, vector<1x128xf32>
    %c0_3 = arith.constant 0 : index
    %c0_4 = arith.constant 0 : index
    %2 = vector.load %arg3[%c0_3, %c0_4] : memref<1x128xf32, #tpu.memory_space<vmem>>, vector<1x128xf32>
    %cst = arith.constant dense<0.000000e+00> : vector<16xf32>
    %3 = vector.multi_reduction <add>, %0, %cst [1] : vector<16x128xf32> to vector<16xf32>
    %4 = vector.shape_cast %3 : vector<16xf32> to vector<16x1xf32>
    %cst_5 = arith.constant 1.280000e+02 : f32
    %5 = vector.broadcast %cst_5 : f32 to vector<16x1xf32>
    %6 = arith.divf %4, %5 : vector<16x1xf32>
    %7 = vector.broadcast %6 : vector<16x1xf32> to vector<16x128xf32>
    %8 = arith.subf %0, %7 : vector<16x128xf32>
    %9 = arith.mulf %8, %8 : vector<16x128xf32>
    %cst_6 = arith.constant dense<0.000000e+00> : vector<16xf32>
    %10 = vector.multi_reduction <add>, %9, %cst_6 [1] : vector<16x128xf32> to vector<16xf32>
    %11 = vector.shape_cast %10 : vector<16xf32> to vector<16x1xf32>
    %cst_7 = arith.constant 1.280000e+02 : f32
    %12 = vector.broadcast %cst_7 : f32 to vector<16x1xf32>
    %13 = arith.divf %11, %12 : vector<16x1xf32>
    %cst_8 = arith.constant 9.99999974E-6 : f32
    %14 = vector.broadcast %cst_8 : f32 to vector<16x1xf32>
    %15 = arith.addf %13, %14 : vector<16x1xf32>
    %16 = math.rsqrt %15 : vector<16x1xf32>
    %17 = vector.broadcast %16 : vector<16x1xf32> to vector<16x128xf32>
    %18 = arith.mulf %8, %17 : vector<16x128xf32>
    %19 = vector.broadcast %1 : vector<1x128xf32> to vector<16x128xf32>
    %20 = arith.mulf %18, %19 : vector<16x128xf32>
    %21 = vector.broadcast %2 : vector<1x128xf32> to vector<16x128xf32>
    %22 = arith.addf %20, %21 : vector<16x128xf32>
    %23 = arith.truncf %22 : vector<16x128xf32> to vector<16x128xbf16>
    %c0_9 = arith.constant 0 : index
    %c0_10 = arith.constant 0 : index
    %24 = vector.load %arg6[%c0_9, %c0_10] : memref<128x384xbf16, #tpu.memory_space<vmem>>, vector<128x384xbf16>
    %cst_11 = arith.constant dense<0.000000e+00> : vector<16x384xf32>
    %25 = tpu.matmul %23, %24, %cst_11 {dimension_numbers = #tpu.dot_dimension_numbers<[1], [0], [0], [1], [0, 0, 1, 1], [], []>} : vector<16x128xbf16>, vector<128x384xbf16>, vector<16x384xf32> -> vector<16x384xf32>
    %26 = vector.extract_strided_slice %25 {offsets = [0, 0], sizes = [16, 128], strides = [1, 1]} : vector<16x384xf32> to vector<16x128xf32>
    %27 = vector.extract_strided_slice %25 {offsets = [0, 128], sizes = [16, 128], strides = [1, 1]} : vector<16x384xf32> to vector<16x128xf32>
    %28 = vector.extract_strided_slice %25 {offsets = [0, 256], sizes = [16, 128], strides = [1, 1]} : vector<16x384xf32> to vector<16x128xf32>
    %29 = arith.truncf %26 : vector<16x128xf32> to vector<16x128xbf16>
    %30 = arith.truncf %27 : vector<16x128xf32> to vector<16x128xbf16>
    %31 = arith.truncf %28 : vector<16x128xf32> to vector<16x128xbf16>
    %32 = tpu.iota {dimensions = array<i32: 0>} : vector<16x16xi32>
    %c2_i32 = arith.constant 2 : i32
    %c0_i32 = arith.constant 0 : i32
    %33 = arith.cmpi eq, %c2_i32, %c0_i32 : i32
    %c1_i32 = arith.constant 1 : i32
    %34 = arith.select %33, %c1_i32, %c2_i32 : i32
    %35 = vector.broadcast %34 : i32 to vector<16x16xi32>
    %36 = arith.remsi %32, %35 : vector<16x16xi32>
    %c0_i32_12 = arith.constant 0 : i32
    %37 = vector.broadcast %c0_i32_12 : i32 to vector<16x16xi32>
    %38 = arith.cmpi ne, %36, %37 : vector<16x16xi32>
    %c0_i32_13 = arith.constant 0 : i32
    %39 = vector.broadcast %c0_i32_13 : i32 to vector<16x16xi32>
    %40 = arith.cmpi slt, %36, %39 : vector<16x16xi32>
    %c0_i32_14 = arith.constant 0 : i32
    %41 = arith.cmpi slt, %34, %c0_i32_14 : i32
    %42 = vector.broadcast %41 : i1 to vector<16x16xi1>
    %43 = vector.broadcast %42 : vector<16x16xi1> to vector<16x16xi1>
    %44 = arith.xori %40, %43 : vector<16x16xi1>
    %45 = arith.andi %44, %38 : vector<16x16xi1>
    %46 = vector.broadcast %34 : i32 to vector<16x16xi32>
    %47 = arith.addi %36, %46 : vector<16x16xi32>
    %48 = arith.select %45, %47, %36 : vector<16x16xi1>, vector<16x16xi32>
    %49 = tpu.iota {dimensions = array<i32: 1>} : vector<16x16xi32>
    %c2_i32_15 = arith.constant 2 : i32
    %c0_i32_16 = arith.constant 0 : i32
    %50 = arith.cmpi eq, %c2_i32_15, %c0_i32_16 : i32
    %c1_i32_17 = arith.constant 1 : i32
    %51 = arith.select %50, %c1_i32_17, %c2_i32_15 : i32
    %52 = vector.broadcast %51 : i32 to vector<16x16xi32>
    %53 = arith.remsi %49, %52 : vector<16x16xi32>
    %c0_i32_18 = arith.constant 0 : i32
    %54 = vector.broadcast %c0_i32_18 : i32 to vector<16x16xi32>
    %55 = arith.cmpi ne, %53, %54 : vector<16x16xi32>
    %c0_i32_19 = arith.constant 0 : i32
    %56 = vector.broadcast %c0_i32_19 : i32 to vector<16x16xi32>
    %57 = arith.cmpi slt, %53, %56 : vector<16x16xi32>
    %c0_i32_20 = arith.constant 0 : i32
    %58 = arith.cmpi slt, %51, %c0_i32_20 : i32
    %59 = vector.broadcast %58 : i1 to vector<16x16xi1>
    %60 = vector.broadcast %59 : vector<16x16xi1> to vector<16x16xi1>
    %61 = arith.xori %57, %60 : vector<16x16xi1>
    %62 = arith.andi %61, %55 : vector<16x16xi1>
    %63 = vector.broadcast %51 : i32 to vector<16x16xi32>
    %64 = arith.addi %53, %63 : vector<16x16xi32>
    %65 = arith.select %62, %64, %53 : vector<16x16xi1>, vector<16x16xi32>
    %66 = arith.cmpi eq, %48, %65 : vector<16x16xi32>
    %cst_21 = arith.constant 0.000000e+00 : f32
    %cst_22 = arith.constant -1.000000e+30 : f32
    %67 = vector.broadcast %cst_21 : f32 to vector<16x16xf32>
    %68 = vector.broadcast %cst_22 : f32 to vector<16x16xf32>
    %69 = arith.select %66, %67, %68 : vector<16x16xi1>, vector<16x16xf32>
    %70 = vector.extract_strided_slice %29 {offsets = [0, 0], sizes = [16, 32], strides = [1, 1]} : vector<16x128xbf16> to vector<16x32xbf16>
    %71 = vector.extract_strided_slice %30 {offsets = [0, 0], sizes = [16, 32], strides = [1, 1]} : vector<16x128xbf16> to vector<16x32xbf16>
    %72 = vector.extract_strided_slice %31 {offsets = [0, 0], sizes = [16, 32], strides = [1, 1]} : vector<16x128xbf16> to vector<16x32xbf16>
    "tpu.trace_start"() <{level = 10 : i32, message = "qd,kd->qk"}> : () -> ()
    %cst_23 = arith.constant dense<0.000000e+00> : vector<16x16xf32>
    %73 = tpu.matmul %70, %71, %cst_23 {dimension_numbers = #tpu.dot_dimension_numbers<[1], [1], [0], [0], [0, 0, 1, 0], [], []>} : vector<16x32xbf16>, vector<16x32xbf16>, vector<16x16xf32> -> vector<16x16xf32>
    "tpu.trace_stop"() : () -> ()
    %74 = arith.addf %73, %69 : vector<16x16xf32>
    %cst_24 = arith.constant dense<0xFF800000> : vector<16xf32>
    %75 = vector.multi_reduction <maximumf>, %74, %cst_24 [1] : vector<16x16xf32> to vector<16xf32>
    %76 = vector.shape_cast %75 : vector<16xf32> to vector<16x1xf32>
    %77 = vector.broadcast %76 : vector<16x1xf32> to vector<16x16xf32>
    %78 = arith.subf %74, %77 : vector<16x16xf32>
    %79 = math.exp %78 : vector<16x16xf32>
    %cst_25 = arith.constant dense<0.000000e+00> : vector<16xf32>
    %80 = vector.multi_reduction <add>, %79, %cst_25 [1] : vector<16x16xf32> to vector<16xf32>
    %81 = vector.shape_cast %80 : vector<16xf32> to vector<16x1xf32>
    %82 = tpu.reciprocal %81 {approx = true} : vector<16x1xf32> -> vector<16x1xf32>
    %83 = vector.broadcast %82 : vector<16x1xf32> to vector<16x16xf32>
    %84 = arith.mulf %79, %83 : vector<16x16xf32>
    %85 = arith.truncf %84 : vector<16x16xf32> to vector<16x16xbf16>
    %cst_26 = arith.constant dense<0.000000e+00> : vector<16x32xf32>
    %86 = tpu.matmul %85, %72, %cst_26 {dimension_numbers = #tpu.dot_dimension_numbers<[1], [0], [0], [1], [0, 0, 1, 1], [], []>} : vector<16x16xbf16>, vector<16x32xbf16>, vector<16x32xf32> -> vector<16x32xf32>
    %87 = vector.extract_strided_slice %29 {offsets = [0, 32], sizes = [16, 32], strides = [1, 1]} : vector<16x128xbf16> to vector<16x32xbf16>
    %88 = vector.extract_strided_slice %30 {offsets = [0, 32], sizes = [16, 32], strides = [1, 1]} : vector<16x128xbf16> to vector<16x32xbf16>
    %89 = vector.extract_strided_slice %31 {offsets = [0, 32], sizes = [16, 32], strides = [1, 1]} : vector<16x128xbf16> to vector<16x32xbf16>
    "tpu.trace_start"() <{level = 10 : i32, message = "qd,kd->qk"}> : () -> ()
    %cst_27 = arith.constant dense<0.000000e+00> : vector<16x16xf32>
    %90 = tpu.matmul %87, %88, %cst_27 {dimension_numbers = #tpu.dot_dimension_numbers<[1], [1], [0], [0], [0, 0, 1, 0], [], []>} : vector<16x32xbf16>, vector<16x32xbf16>, vector<16x16xf32> -> vector<16x16xf32>
    "tpu.trace_stop"() : () -> ()
    %91 = arith.addf %90, %69 : vector<16x16xf32>
    %cst_28 = arith.constant dense<0xFF800000> : vector<16xf32>
    %92 = vector.multi_reduction <maximumf>, %91, %cst_28 [1] : vector<16x16xf32> to vector<16xf32>
    %93 = vector.shape_cast %92 : vector<16xf32> to vector<16x1xf32>
    %94 = vector.broadcast %93 : vector<16x1xf32> to vector<16x16xf32>
    %95 = arith.subf %91, %94 : vector<16x16xf32>
    %96 = math.exp %95 : vector<16x16xf32>
    %cst_29 = arith.constant dense<0.000000e+00> : vector<16xf32>
    %97 = vector.multi_reduction <add>, %96, %cst_29 [1] : vector<16x16xf32> to vector<16xf32>
    %98 = vector.shape_cast %97 : vector<16xf32> to vector<16x1xf32>
    %99 = tpu.reciprocal %98 {approx = true} : vector<16x1xf32> -> vector<16x1xf32>
    %100 = vector.broadcast %99 : vector<16x1xf32> to vector<16x16xf32>
    %101 = arith.mulf %96, %100 : vector<16x16xf32>
    %102 = arith.truncf %101 : vector<16x16xf32> to vector<16x16xbf16>
    %cst_30 = arith.constant dense<0.000000e+00> : vector<16x32xf32>
    %103 = tpu.matmul %102, %89, %cst_30 {dimension_numbers = #tpu.dot_dimension_numbers<[1], [0], [0], [1], [0, 0, 1, 1], [], []>} : vector<16x16xbf16>, vector<16x32xbf16>, vector<16x32xf32> -> vector<16x32xf32>
    %104 = vector.extract_strided_slice %29 {offsets = [0, 64], sizes = [16, 32], strides = [1, 1]} : vector<16x128xbf16> to vector<16x32xbf16>
    %105 = vector.extract_strided_slice %30 {offsets = [0, 64], sizes = [16, 32], strides = [1, 1]} : vector<16x128xbf16> to vector<16x32xbf16>
    %106 = vector.extract_strided_slice %31 {offsets = [0, 64], sizes = [16, 32], strides = [1, 1]} : vector<16x128xbf16> to vector<16x32xbf16>
    "tpu.trace_start"() <{level = 10 : i32, message = "qd,kd->qk"}> : () -> ()
    %cst_31 = arith.constant dense<0.000000e+00> : vector<16x16xf32>
    %107 = tpu.matmul %104, %105, %cst_31 {dimension_numbers = #tpu.dot_dimension_numbers<[1], [1], [0], [0], [0, 0, 1, 0], [], []>} : vector<16x32xbf16>, vector<16x32xbf16>, vector<16x16xf32> -> vector<16x16xf32>
    "tpu.trace_stop"() : () -> ()
    %108 = arith.addf %107, %69 : vector<16x16xf32>
    %cst_32 = arith.constant dense<0xFF800000> : vector<16xf32>
    %109 = vector.multi_reduction <maximumf>, %108, %cst_32 [1] : vector<16x16xf32> to vector<16xf32>
    %110 = vector.shape_cast %109 : vector<16xf32> to vector<16x1xf32>
    %111 = vector.broadcast %110 : vector<16x1xf32> to vector<16x16xf32>
    %112 = arith.subf %108, %111 : vector<16x16xf32>
    %113 = math.exp %112 : vector<16x16xf32>
    %cst_33 = arith.constant dense<0.000000e+00> : vector<16xf32>
    %114 = vector.multi_reduction <add>, %113, %cst_33 [1] : vector<16x16xf32> to vector<16xf32>
    %115 = vector.shape_cast %114 : vector<16xf32> to vector<16x1xf32>
    %116 = tpu.reciprocal %115 {approx = true} : vector<16x1xf32> -> vector<16x1xf32>
    %117 = vector.broadcast %116 : vector<16x1xf32> to vector<16x16xf32>
    %118 = arith.mulf %113, %117 : vector<16x16xf32>
    %119 = arith.truncf %118 : vector<16x16xf32> to vector<16x16xbf16>
    %cst_34 = arith.constant dense<0.000000e+00> : vector<16x32xf32>
    %120 = tpu.matmul %119, %106, %cst_34 {dimension_numbers = #tpu.dot_dimension_numbers<[1], [0], [0], [1], [0, 0, 1, 1], [], []>} : vector<16x16xbf16>, vector<16x32xbf16>, vector<16x32xf32> -> vector<16x32xf32>
    %121 = vector.extract_strided_slice %29 {offsets = [0, 96], sizes = [16, 32], strides = [1, 1]} : vector<16x128xbf16> to vector<16x32xbf16>
    %122 = vector.extract_strided_slice %30 {offsets = [0, 96], sizes = [16, 32], strides = [1, 1]} : vector<16x128xbf16> to vector<16x32xbf16>
    %123 = vector.extract_strided_slice %31 {offsets = [0, 96], sizes = [16, 32], strides = [1, 1]} : vector<16x128xbf16> to vector<16x32xbf16>
    "tpu.trace_start"() <{level = 10 : i32, message = "qd,kd->qk"}> : () -> ()
    %cst_35 = arith.constant dense<0.000000e+00> : vector<16x16xf32>
    %124 = tpu.matmul %121, %122, %cst_35 {dimension_numbers = #tpu.dot_dimension_numbers<[1], [1], [0], [0], [0, 0, 1, 0], [], []>} : vector<16x32xbf16>, vector<16x32xbf16>, vector<16x16xf32> -> vector<16x16xf32>
    "tpu.trace_stop"() : () -> ()
    %125 = arith.addf %124, %69 : vector<16x16xf32>
    %cst_36 = arith.constant dense<0xFF800000> : vector<16xf32>
    %126 = vector.multi_reduction <maximumf>, %125, %cst_36 [1] : vector<16x16xf32> to vector<16xf32>
    %127 = vector.shape_cast %126 : vector<16xf32> to vector<16x1xf32>
    %128 = vector.broadcast %127 : vector<16x1xf32> to vector<16x16xf32>
    %129 = arith.subf %125, %128 : vector<16x16xf32>
    %130 = math.exp %129 : vector<16x16xf32>
    %cst_37 = arith.constant dense<0.000000e+00> : vector<16xf32>
    %131 = vector.multi_reduction <add>, %130, %cst_37 [1] : vector<16x16xf32> to vector<16xf32>
    %132 = vector.shape_cast %131 : vector<16xf32> to vector<16x1xf32>
    %133 = tpu.reciprocal %132 {approx = true} : vector<16x1xf32> -> vector<16x1xf32>
    %134 = vector.broadcast %133 : vector<16x1xf32> to vector<16x16xf32>
    %135 = arith.mulf %130, %134 : vector<16x16xf32>
    %136 = arith.truncf %135 : vector<16x16xf32> to vector<16x16xbf16>
    %cst_38 = arith.constant dense<0.000000e+00> : vector<16x32xf32>
    %137 = tpu.matmul %136, %123, %cst_38 {dimension_numbers = #tpu.dot_dimension_numbers<[1], [0], [0], [1], [0, 0, 1, 1], [], []>} : vector<16x16xbf16>, vector<16x32xbf16>, vector<16x32xf32> -> vector<16x32xf32>
    %138 = tpu.concatenate %86, %103, %120, %137 in 1 : vector<16x32xf32>, vector<16x32xf32>, vector<16x32xf32>, vector<16x32xf32> -> vector<16x128xf32>
    %139 = arith.truncf %138 : vector<16x128xf32> to vector<16x128xbf16>
    %c0_39 = arith.constant 0 : index
    %c0_40 = arith.constant 0 : index
    %140 = vector.load %arg7[%c0_39, %c0_40] : memref<128x128xbf16, #tpu.memory_space<vmem>>, vector<128x128xbf16>
    %cst_41 = arith.constant dense<0.000000e+00> : vector<16x128xf32>
    %141 = tpu.matmul %139, %140, %cst_41 {dimension_numbers = #tpu.dot_dimension_numbers<[1], [0], [0], [1], [0, 0, 1, 1], [], []>} : vector<16x128xbf16>, vector<128x128xbf16>, vector<16x128xf32> -> vector<16x128xf32>
    %142 = arith.addf %0, %141 : vector<16x128xf32>
    %c0_42 = arith.constant 0 : index
    %c0_43 = arith.constant 0 : index
    %143 = vector.load %arg4[%c0_42, %c0_43] : memref<1x128xf32, #tpu.memory_space<vmem>>, vector<1x128xf32>
    %c0_44 = arith.constant 0 : index
    %c0_45 = arith.constant 0 : index
    %144 = vector.load %arg5[%c0_44, %c0_45] : memref<1x128xf32, #tpu.memory_space<vmem>>, vector<1x128xf32>
    %cst_46 = arith.constant dense<0.000000e+00> : vector<16xf32>
    %145 = vector.multi_reduction <add>, %142, %cst_46 [1] : vector<16x128xf32> to vector<16xf32>
    %146 = vector.shape_cast %145 : vector<16xf32> to vector<16x1xf32>
    %cst_47 = arith.constant 1.280000e+02 : f32
    %147 = vector.broadcast %cst_47 : f32 to vector<16x1xf32>
    %148 = arith.divf %146, %147 : vector<16x1xf32>
    %149 = vector.broadcast %148 : vector<16x1xf32> to vector<16x128xf32>
    %150 = arith.subf %142, %149 : vector<16x128xf32>
    %151 = arith.mulf %150, %150 : vector<16x128xf32>
    %cst_48 = arith.constant dense<0.000000e+00> : vector<16xf32>
    %152 = vector.multi_reduction <add>, %151, %cst_48 [1] : vector<16x128xf32> to vector<16xf32>
    %153 = vector.shape_cast %152 : vector<16xf32> to vector<16x1xf32>
    %cst_49 = arith.constant 1.280000e+02 : f32
    %154 = vector.broadcast %cst_49 : f32 to vector<16x1xf32>
    %155 = arith.divf %153, %154 : vector<16x1xf32>
    %cst_50 = arith.constant 9.99999974E-6 : f32
    %156 = vector.broadcast %cst_50 : f32 to vector<16x1xf32>
    %157 = arith.addf %155, %156 : vector<16x1xf32>
    %158 = math.rsqrt %157 : vector<16x1xf32>
    %159 = vector.broadcast %158 : vector<16x1xf32> to vector<16x128xf32>
    %160 = arith.mulf %150, %159 : vector<16x128xf32>
    %161 = vector.broadcast %143 : vector<1x128xf32> to vector<16x128xf32>
    %162 = arith.mulf %160, %161 : vector<16x128xf32>
    %163 = vector.broadcast %144 : vector<1x128xf32> to vector<16x128xf32>
    %164 = arith.addf %162, %163 : vector<16x128xf32>
    %165 = arith.truncf %164 : vector<16x128xf32> to vector<16x128xbf16>
    %c0_51 = arith.constant 0 : index
    %c0_52 = arith.constant 0 : index
    %166 = vector.load %arg8[%c0_51, %c0_52] : memref<128x256xbf16, #tpu.memory_space<vmem>>, vector<128x256xbf16>
    %cst_53 = arith.constant dense<0.000000e+00> : vector<16x256xf32>
    %167 = tpu.matmul %165, %166, %cst_53 {dimension_numbers = #tpu.dot_dimension_numbers<[1], [0], [0], [1], [0, 0, 1, 1], [], []>} : vector<16x128xbf16>, vector<128x256xbf16>, vector<16x256xf32> -> vector<16x256xf32>
    %c0_54 = arith.constant 0 : index
    %c0_55 = arith.constant 0 : index
    %168 = vector.load %arg9[%c0_54, %c0_55] : memref<1x256xf32, #tpu.memory_space<vmem>>, vector<1x256xf32>
    %169 = vector.broadcast %168 : vector<1x256xf32> to vector<16x256xf32>
    %170 = arith.addf %167, %169 : vector<16x256xf32>
    %cst_56 = arith.constant 0.000000e+00 : f32
    %171 = vector.broadcast %cst_56 : f32 to vector<16x256xf32>
    %172 = arith.maximumf %170, %171 : vector<16x256xf32>
    %173 = arith.truncf %172 : vector<16x256xf32> to vector<16x256xbf16>
    %c0_57 = arith.constant 0 : index
    %c0_58 = arith.constant 0 : index
    %174 = vector.load %arg10[%c0_57, %c0_58] : memref<256x128xbf16, #tpu.memory_space<vmem>>, vector<256x128xbf16>
    %cst_59 = arith.constant dense<0.000000e+00> : vector<16x128xf32>
    %175 = tpu.matmul %173, %174, %cst_59 {dimension_numbers = #tpu.dot_dimension_numbers<[1], [0], [0], [1], [0, 0, 1, 1], [], []>} : vector<16x256xbf16>, vector<256x128xbf16>, vector<16x128xf32> -> vector<16x128xf32>
    %c0_60 = arith.constant 0 : index
    %c0_61 = arith.constant 0 : index
    %176 = vector.load %arg11[%c0_60, %c0_61] : memref<1x128xf32, #tpu.memory_space<vmem>>, vector<1x128xf32>
    %177 = vector.broadcast %176 : vector<1x128xf32> to vector<16x128xf32>
    %178 = arith.addf %175, %177 : vector<16x128xf32>
    %179 = arith.addf %142, %178 : vector<16x128xf32>
    %c0_62 = arith.constant 0 : index
    %c0_63 = arith.constant 0 : index
    %180 = vector.load %arg12[%c0_62, %c0_63] : memref<16x128xf32, #tpu.memory_space<vmem>>, vector<16x128xf32>
    tpu.vector_store %arg12[%c0_62, %c0_63], %179 {strides = array<i32>} : memref<16x128xf32, #tpu.memory_space<vmem>>, vector<16x128xf32>,
    return
  }
  func.func @transform_0(%arg0: i32) -> (i32, i32) {
    %c0_i32 = arith.constant 0 : i32
    %c0_i32_0 = arith.constant 0 : i32
    %c0_i32_1 = arith.constant 0 : i32
    return %c0_i32, %c0_i32_0 : i32, i32
  }
  func.func @transform_1(%arg0: i32) -> (i32, i32) {
    %c0_i32 = arith.constant 0 : i32
    %c0_i32_0 = arith.constant 0 : i32
    %c0_i32_1 = arith.constant 0 : i32
    return %c0_i32, %c0_i32_0 : i32, i32
  }
  func.func @transform_2(%arg0: i32) -> (i32, i32) {
    %c0_i32 = arith.constant 0 : i32
    %c0_i32_0 = arith.constant 0 : i32
    %c0_i32_1 = arith.constant 0 : i32
    return %c0_i32, %c0_i32_0 : i32, i32
  }
  func.func @transform_3(%arg0: i32) -> (i32, i32) {
    %c0_i32 = arith.constant 0 : i32
    %c0_i32_0 = arith.constant 0 : i32
    %c0_i32_1 = arith.constant 0 : i32
    return %c0_i32, %c0_i32_0 : i32, i32
  }
  func.func @transform_4(%arg0: i32) -> (i32, i32) {
    %c0_i32 = arith.constant 0 : i32
    %c0_i32_0 = arith.constant 0 : i32
    %c0_i32_1 = arith.constant 0 : i32
    return %c0_i32, %c0_i32_0 : i32, i32
  }
  func.func @transform_5(%arg0: i32) -> (i32, i32) {
    %c0_i32 = arith.constant 0 : i32
    %c0_i32_0 = arith.constant 0 : i32
    %c0_i32_1 = arith.constant 0 : i32
    return %c0_i32, %c0_i32_0 : i32, i32
  }
  func.func @transform_6(%arg0: i32) -> (i32, i32) {
    %c0_i32 = arith.constant 0 : i32
    %c0_i32_0 = arith.constant 0 : i32
    %c0_i32_1 = arith.constant 0 : i32
    return %c0_i32, %c0_i32_0 : i32, i32
  }
  func.func @transform_7(%arg0: i32) -> (i32, i32) {
    %c0_i32 = arith.constant 0 : i32
    %c0_i32_0 = arith.constant 0 : i32
    %c0_i32_1 = arith.constant 0 : i32
    return %c0_i32, %c0_i32_0 : i32, i32
  }
  func.func @transform_8(%arg0: i32) -> (i32, i32) {
    %c0_i32 = arith.constant 0 : i32
    %c0_i32_0 = arith.constant 0 : i32
    %c0_i32_1 = arith.constant 0 : i32
    return %c0_i32, %c0_i32_0 : i32, i32
  }
  func.func @transform_9(%arg0: i32) -> (i32, i32) {
    %c0_i32 = arith.constant 0 : i32
    %c0_i32_0 = arith.constant 0 : i32
    %c0_i32_1 = arith.constant 0 : i32
    return %c0_i32, %c0_i32_0 : i32, i32
  }
  func.func @transform_10(%arg0: i32) -> (i32, i32) {
    %c0_i32 = arith.constant 0 : i32
    %c0_i32_0 = arith.constant 0 : i32
    %c0_i32_1 = arith.constant 0 : i32
    return %c0_i32, %c0_i32_0 : i32, i32
  }
  func.func @transform_11(%arg0: i32) -> (i32, i32) {
    %c0_i32 = arith.constant 0 : i32
    %c0_i32_0 = arith.constant 0 : i32
    %c0_i32_1 = arith.constant 0 : i32
    return %c0_i32, %c0_i32_0 : i32, i32
  }
}

</mosaic_0001>

<bundles_post_ra>
// kernel: transformer_encoder_layer_forward.1
= control target key start
LH: loop header
LB: loop body
LE: loop exit
PB: predicated region body
PF: predicated region fallthrough
CT: control target
= control target key end

     0   :  { %16 = vsyncpa [#allocation3], 0  ;;  %s2267_s0 = inlined_call_operand.vmem [shape: f32[16,128], index: 0, kind: input, shape index: {}]   ;;  %s2268_s1 = inlined_call_operand.vmem [shape: f32[1,128], index: 1, kind: input, shape index: {}]   ;;  %s2269_s2 = inlined_call_operand.vmem [shape: f32[1,128], index: 2, kind: input, shape index: {}]   ;;  %s2270_s3 = inlined_call_operand.vmem [shape: f32[1,128], index: 3, kind: input, shape index: {}]   ;;  %s2271_s4 = inlined_call_operand.vmem [shape: f32[1,128], index: 4, kind: input, shape index: {}]   ;;  %s2272_s5 = inlined_call_operand.hbm [shape: bf16[128,384], index: 5, kind: input, shape index: {}]   ;;  %s2273_s6 = inlined_call_operand.hbm [shape: bf16[128,128], index: 6, kind: input, shape index: {}]   ;;  %s2274_s7 = inlined_call_operand.hbm [shape: bf16[128,256], index: 7, kind: input, shape index: {}]   ;;  %s2275_s8 = inlined_call_operand.vmem [shape: f32[1,256], index: 8, kind: input, shape index: {}]   ;;  %s2276_s9 = inlined_call_operand.hbm [shape: bf16[256,128], index: 9, kind: input, shape index: {}]   ;;  %s2277_s10 = inlined_call_operand.vmem [shape: f32[1,128], index: 10, kind: input, shape index: {}]   ;;  %s2278_s11 = inlined_call_operand.hbm [shape: f32[16,128], index: 11, kind: output, shape index: {}]  }
   0x1   :  { %17 = vsyncpa [#allocation6], 0 }
   0x2   :  { %18 = vsyncpa [#allocation9], 0 }
   0x3   :  { %19 = vsyncpa [#allocation4], 0  ;;  %s1941_s17 = smov [#allocation5]   ;;  %s1823_s21 = scalar_lea.hbm %s2273_s6, 1024 }
   0x4   :  { %s47_s18 = sshll.u32 %s1941_s17, 4  ;;  %p1824_p0 = scmp.ne.s32.totalorder %s2273_s6, %s1823_s21  ;;  %s48_s18 = int_to_ptr.vmem [resolvable:$true] %s47_s18 }
   0x5   :  { %p1827_p1 = scmp.lt.u32.totalorder %s1823_s21, %s2273_s6 }
   0x7   :  { %p1829_p2 = pnand %p1827_p1, %p1824_p0 }
   0x9   :  { %1832 = shalt.err (!%p1829_p2)
}
   0xa   :  { %s1833_s26 = scalar_lea.vmem %s48_s18, 1024  ;;  %p1838_p4 = scmp.lt.s32.totalorder %s48_s18, %s48_s18 }
   0xb   :  { %p1834_p3 = scmp.ne.s32.totalorder %s48_s18, %s1833_s26  ;;  %p1839_p5 = scmp.lt.s32.totalorder %s1833_s26, %s1833_s26 }
   0xd   :  { %p1840_p6 = por %p1839_p5, %p1838_p4 }
   0xf   :  { %p1841_p7 = pnand %p1840_p6, %p1834_p3 }
  0x11   :  { %1844 = shalt.err (!%p1841_p7)
}
  0x12   :  { %s1942_s27 = smov 64   ;;  %s1943_s28 = smov 4  }
  0x13   :  { %53 = dma.hbm_to_vmem [thread:$0]  %s2273_s6, 1024, %s48_s18, [#allocation6], %s1942_s27, %s1942_s27, %s1943_s28  }
  0x14   :  { %s1944_s12 = smov [#allocation2]   ;;  %s1845_s16 = scalar_lea.hbm %s2272_s5, 3072 }
  0x15   :  { %s35_s13 = sshll.u32 %s1944_s12, 4  ;;  %p1846_p8 = scmp.ne.s32.totalorder %s2272_s5, %s1845_s16  ;;  %s36_s13 = int_to_ptr.vmem [resolvable:$true] %s35_s13 }
  0x16   :  { %p1849_p9 = scmp.lt.u32.totalorder %s1845_s16, %s2272_s5 }
  0x18   :  { %p1851_p10 = pnand %p1849_p9, %p1846_p8 }
  0x1a   :  { %1854 = shalt.err (!%p1851_p10)
}
  0x1b   :  { %s1855_s22 = scalar_lea.vmem %s36_s13, 3072  ;;  %p1860_p12 = scmp.lt.s32.totalorder %s36_s13, %s36_s13 }
  0x1c   :  { %p1856_p11 = scmp.ne.s32.totalorder %s36_s13, %s1855_s22  ;;  %p1861_p13 = scmp.lt.s32.totalorder %s1855_s22, %s1855_s22 }
  0x1e   :  { %p1862_p0 = por %p1861_p13, %p1860_p12 }
  0x20   :  { %p1863_p1 = pnand %p1862_p0, %p1856_p11 }
  0x22   :  { %1866 = shalt.err (!%p1863_p1)
}
  0x23   :  { %s1945_s6 = smov 192   ;;  %s1946_s18 = smov 12  }
  0x24   :  { %41 = dma.hbm_to_vmem [thread:$0]  %s2272_s5, 3072, %s36_s13, [#allocation3], %s1945_s6, %s1945_s6, %s1946_s18  }
  0x25   :  { %s1947_s25 = smov [#allocation7]   ;;  %s1867_s12 = scalar_lea.hbm %s2274_s7, 2048 }
  0x26   :  { %s59_s26 = sshll.u32 %s1947_s25, 4  ;;  %p1868_p2 = scmp.ne.s32.totalorder %s2274_s7, %s1867_s12  ;;  %s60_s26 = int_to_ptr.vmem [resolvable:$true] %s59_s26 }
  0x27   :  { %p1871_p3 = scmp.lt.u32.totalorder %s1867_s12, %s2274_s7 }
  0x29   :  { %p1873_p4 = pnand %p1871_p3, %p1868_p2 }
  0x2b   :  { %1876 = shalt.err (!%p1873_p4)
}
  0x2c   :  { %s1877_s19 = scalar_lea.vmem %s60_s26, 2048  ;;  %p1882_p6 = scmp.lt.s32.totalorder %s60_s26, %s60_s26 }
  0x2d   :  { %p1878_p5 = scmp.ne.s32.totalorder %s60_s26, %s1877_s19  ;;  %p1883_p7 = scmp.lt.s32.totalorder %s1877_s19, %s1877_s19 }
  0x2f   :  { %p1884_p8 = por %p1883_p7, %p1882_p6 }
  0x31   :  { %p1885_p9 = pnand %p1884_p8, %p1878_p5 }
  0x33   :  { %1888 = shalt.err (!%p1885_p9)
}
  0x34   :  { %s1948_s5 = smov 128   ;;  %s1949_s13 = smov 8  }
  0x35   :  { %65 = dma.hbm_to_vmem [thread:$0]  %s2274_s7, 2048, %s60_s26, [#allocation6], %s1948_s5, %s1948_s5, %s1949_s13  }
  0x36   :  { %s1950_s22 = smov [#allocation8]   ;;  %s1889_s24 = scalar_lea.hbm %s2276_s9, 2048 }
  0x37   :  { %s73_s6 = sshll.u32 %s1950_s22, 4  ;;  %p1890_p10 = scmp.ne.s32.totalorder %s2276_s9, %s1889_s24  ;;  %s74_s6 = int_to_ptr.vmem [resolvable:$true] %s73_s6 }
  0x38   :  { %p1893_p11 = scmp.lt.u32.totalorder %s1889_s24, %s2276_s9 }
  0x3a   :  { %p1895_p12 = pnand %p1893_p11, %p1890_p10 }
  0x3c   :  { %1898 = shalt.err (!%p1895_p12)
}
  0x3d   :  { %s1899_s14 = scalar_lea.vmem %s74_s6, 2048  ;;  %p1904_p0 = scmp.lt.s32.totalorder %s74_s6, %s74_s6 }
  0x3e   :  { %p1900_p13 = scmp.ne.s32.totalorder %s74_s6, %s1899_s14  ;;  %p1905_p1 = scmp.lt.s32.totalorder %s1899_s14, %s1899_s14 }
  0x40   :  { %p1906_p2 = por %p1905_p1, %p1904_p0 }
  0x42   :  { %p1907_p3 = pnand %p1906_p2, %p1900_p13 }
  0x44   :  { %1910 = shalt.err (!%p1907_p3)
}
  0x45   :  { %79 = dma.hbm_to_vmem [thread:$0]  %s2276_s9, 2048, %s74_s6, [#allocation9], %s1942_s27, %s1942_s27, %s1943_s28  }
  0x46   :  { %1933 = dma.done.wait [#allocation3], 3072  }
  0x47   :  { %1934 = vsyncadd [#allocation3], 4294964224 }
  0x48   :  { %1935 = dma.done.wait [#allocation6], 3072  }
  0x49   :  { %1936 = vsyncadd [#allocation6], 4294964224 }
  0x4a   :  { %1937 = dma.done.wait [#allocation9], 2048  }
  0x4b   :  { %1938 = vsyncadd [#allocation9], 4294965248  ;;  %v2078_v0 = vld [vmem:[%s2267_s0] sm:$0xff]  ;;  %v2083_v1 = vld [vmem:[%s2267_s0 + $0x8] sm:$0xff]  ;;  %v1951_v4 = vmov 0.0   ;;  %v1952_v30 = vmov 0  }
  0x4c   :  { %99 = vadd.xlane.f32.xlu0 %v2078_v0  ;;  %v1703_v2 = vld [vmem:[#allocation2 + $0x4] ss:$12 sps:$4 sm:$0xff]   ;;  %v1705_v3 = vld [vmem:[#allocation2] ss:$12 sps:$4 sm:$0xff]   ;;  %1583 = vmatprep.subr.bf16.mxu1 %v1951_v4  ;;  %v1706_v5 = vld [vmem:[#allocation2 + $0x8] ss:$12 sps:$4 sm:$0xff]  }
  0x4d   :  { %v1707_v6 = vld [vmem:[#allocation2 + $0x1c] ss:$12 sps:$4 sm:$0xff]   ;;  %299 = vmatprep.subr.bf16.mxu0 %v1703_v2  ;;  %1584 = vmatpush3.bf16.msra.mxu1 %v1706_v5  ;;  %v1709_v15 = vld [vmem:[#allocation2 + $0x18] ss:$12 sps:$4 sm:$0xff]   ;;  %v1710_v16 = vld [vmem:[#allocation2 + $0x20] ss:$12 sps:$4 sm:$0xff]  }
  0x4e   :  { %300 = vmatpush1.bf16.msra.mxu0 %v1705_v3  ;;  %1585 = vmatprep.subr.bf16.mxu1 %v1951_v4  ;;  %v1711_v17 = vld [vmem:[#allocation2 + $0x34] ss:$12 sps:$4 sm:$0xff]   ;;  %v1713_v18 = vld [vmem:[#allocation2 + $0x30] ss:$12 sps:$4 sm:$0xff]   ;;  %v1714_v19 = vld [vmem:[#allocation2 + $0x38] ss:$12 sps:$4 sm:$0xff]   ;;  %v386_v3 = vlaneseq }
  0x4f   :  { %301 = vmatprep.subr.bf16.mxu0 %v1707_v6  ;;  %v1715_v20 = vld [vmem:[#allocation2 + $0x4c] ss:$12 sps:$4 sm:$0xff]   ;;  %v1717_v21 = vld [vmem:[#allocation2 + $0x48] ss:$12 sps:$4 sm:$0xff]   ;;  %v1718_v22 = vld [vmem:[#allocation2 + $0x50] ss:$12 sps:$4 sm:$0xff]   ;;  %331 = vmatprep.mubr.bf16.mxu0 %v1952_v30 }
  0x50   :  { %101 = vadd.xlane.f32.xlu0 %v2083_v1  ;;  %v1719_v23 = vld [vmem:[#allocation2 + $0x64] ss:$12 sps:$4 sm:$0xff]   ;;  %v1721_v24 = vld [vmem:[#allocation2 + $0x60] ss:$12 sps:$4 sm:$0xff]   ;;  %v1722_v25 = vld [vmem:[#allocation2 + $0x68] ss:$12 sps:$4 sm:$0xff]  }
  0x51   :  { %1586 = vmatpush3.bf16.msra.mxu1 %v1710_v16  ;;  %v1723_v26 = vld [vmem:[#allocation2 + $0x7c] ss:$12 sps:$4 sm:$0xff]   ;;  %v1725_v27 = vld [vmem:[#allocation2 + $0x78] ss:$12 sps:$4 sm:$0xff]   ;;  %v1726_v28 = vld [vmem:[#allocation2 + $0x80] ss:$12 sps:$4 sm:$0xff]  }
  0x52   :  { %302 = vmatpush1.bf16.msra.mxu0 %v1709_v15  ;;  %1587 = vmatprep.subr.bf16.mxu1 %v1951_v4  ;;  %v1727_v29 = vld [vmem:[#allocation2 + $0x94] ss:$12 sps:$4 sm:$0xff]   ;;  %vm1953_vm0 = vmmov 0   ;;  %v1729_v31 = vld [vmem:[#allocation2 + $0x90] ss:$12 sps:$4 sm:$0xff]   ;;  %vm431_vm1 = vcmask 261120  }
  0x53   :  { %303 = vmatprep.subr.bf16.mxu0 %v1711_v17  ;;  %1599 = vmatprep.mubr.msk.bf16.mxu1 %vm1953_vm0, %v1951_v4  ;;  %v1730_v32 = vld [vmem:[#allocation2 + $0x98] ss:$12 sps:$4 sm:$0xff]   ;;  %v1733_v34 = vld [vmem:[#allocation2 + $0xa8] ss:$12 sps:$4 sm:$0xff]   ;;  %v1734_v35 = vld [vmem:[#allocation2 + $0xb0] ss:$12 sps:$4 sm:$0xff]  }
  0x54   :  { %v1731_v33 = vld [vmem:[#allocation2 + $0xac] ss:$12 sps:$4 sm:$0xff]   ;;  %v1450_v44 = vld [vmem:[%s2268_s1] ss:$0 sm:$0xff]  ;;  %v2131_v5 = vshrl.u32 %v386_v3, 7  ;;  %v414_v6 = vand.u32 127, %v386_v3 }
  0x55   :  { %1588 = vmatpush3.bf16.msra.mxu1 %v1714_v19  ;;  %v1451_v48 = vld [vmem:[%s2269_s2] ss:$0 sm:$0xff]  ;;  %vm479_vm4 = vcmask 130048   ;;  %s1955_s1 = smov 96   ;;  %s1956_s2 = smov 32   ;;  %vm939_vm5 = vcmask 523264  }
  0x56   :  { %304 = vmatpush1.bf16.msra.mxu0 %v1713_v18  ;;  %1589 = vmatprep.subr.bf16.mxu1 %v1951_v4  ;;  %vm942_vm6 = vcmask 785408   ;;  %s1957_s23 = smov [#allocation10]  }
  0x57   :  { %305 = vmatprep.subr.bf16.mxu0 %v1715_v20  ;;  %s1436_s24 = sshll.u32 %s1957_s23, 4  ;;  %s1437_s24 = int_to_ptr.vmem [resolvable:$true] %s1436_s24 }
  0x58   :  { %s1911_s25 = scalar_lea.vmem %s1437_s24, 256  ;;  %p1916_p5 = scmp.lt.s32.totalorder %s1437_s24, %s1437_s24 }
  0x59   :  { %1590 = vmatpush3.bf16.msra.mxu1 %v1718_v22  ;;  %p1912_p4 = scmp.ne.s32.totalorder %s1437_s24, %s1911_s25  ;;  %p1917_p6 = scmp.lt.s32.totalorder %s1911_s25, %s1911_s25 }
  0x5a   :  { %306 = vmatpush1.bf16.msra.mxu0 %v1717_v21  ;;  %1591 = vmatprep.subr.bf16.mxu1 %v1951_v4 }
  0x5b   :  { %307 = vmatprep.subr.bf16.mxu0 %v1719_v23  ;;  %p1918_p7 = por %p1917_p6, %p1916_p5 }
  0x5d   :  { %1592 = vmatpush3.bf16.msra.mxu1 %v1722_v25  ;;  %p1919_p8 = pnand %p1918_p7, %p1912_p4 }
  0x5e   :  { %308 = vmatpush1.bf16.msra.mxu0 %v1721_v24  ;;  %1593 = vmatprep.subr.bf16.mxu1 %v1951_v4 }
  0x5f   :  { %309 = vmatprep.subr.bf16.mxu0 %v1723_v26 }
  0x61   :  { %1594 = vmatpush3.bf16.msra.mxu1 %v1726_v28 }
  0x62   :  { %310 = vmatpush1.bf16.msra.mxu0 %v1725_v27  ;;  %1595 = vmatprep.subr.bf16.mxu1 %v1951_v4 }
  0x63   :  { %311 = vmatprep.subr.bf16.mxu0 %v1727_v29 }
  0x65   :  { %1596 = vmatpush3.bf16.msra.mxu1 %v1730_v32 }
  0x66   :  { %312 = vmatpush1.bf16.msra.mxu0 %v1729_v31  ;;  %1597 = vmatprep.subr.bf16.mxu1 %v1951_v4 }
  0x67   :  { %313 = vmatprep.subr.bf16.mxu0 %v1731_v33 }
  0x69   :  { %1598 = vmatpush3.bf16.msra.mxu1 %v1734_v35 }
  0x6a   :  { %314 = vmatpush1.bf16.msra.mxu0 %v1733_v34  ;;  %1603 = vmatprep.subr.bf16.mxu1 %v1951_v4 }
  0x6b   :  { %1627 = vmatprep.subr.bf16.mxu0 %v1951_v4 }
  0xd9   :  { %v100_v7 = vpop.xlane.xlu0 %99 }
  0xda   :  { %v104_v8 = vmul.f32 0.0078125, %v100_v7  ;;  %v388_v7 = vadd.s32 8, %v2131_v5 }
  0xdc   :  { %v2090_v9 = vsub.f32 %v2078_v0, %v104_v8  ;;  %v393_v8 = vand.u32 1, %v2131_v5 }
  0xdd   :  { %v102_v10 = vpop.xlane.xlu0 %101 }
  0xde   :  { %v105_v11 = vmul.f32 0.0078125, %v102_v10  ;;  %v108_v12 = vmul.f32 %v2090_v9, %v2090_v9  ;;  %v400_v10 = vand.u32 1, %v388_v7 }
  0xe0   :  { %v2095_v13 = vsub.f32 %v2083_v1, %v105_v11  ;;  %110 = vadd.xlane.f32.xlu1 %v108_v12  ;;  %v1954_v11 = vmov -1e+30  }
  0xe2   :  { %v109_v14 = vmul.f32 %v2095_v13, %v2095_v13 }
  0xe4   :  { %112 = vadd.xlane.f32.xlu1 %v109_v14 }
 0x16d   :  { %v111_v36 = vpop.xlane.xlu1 %110 }
 0x16e   :  { %v114_v37 = vmul.f32 0.0078125, %v111_v36 }
 0x170   :  { %v116_v38 = vadd.f32 1e-05, %v114_v37 }
 0x171   :  { %v113_v39 = vpop.xlane.xlu1 %112 }
 0x172   :  { %1783 = vrsqrt.f32 %v116_v38  ;;  %v115_v40 = vmul.f32 0.0078125, %v113_v39 }
 0x174   :  { %v117_v41 = vadd.f32 1e-05, %v115_v40 }
 0x176   :  { %1785 = vrsqrt.f32 %v117_v41 }
 0x17c   :  { %v1784_v42 = vpop.eup %1783 }
 0x17d   :  { %v120_v43 = vmul.f32 %v1784_v42, %v2090_v9  ;;  %v419_v9 = vand.u32 1, %v414_v6 }
 0x17f   :  { %v128_v47 = vmul.f32 %v1450_v44, %v120_v43  ;;  %vm427_vm2 = vcmp.eq.s32.totalorder %v393_v8, %v419_v9  ;;  %vm428_vm3 = vcmp.eq.s32.totalorder %v400_v10, %v419_v9 }
 0x180   :  { %v1786_v45 = vpop.eup %1785  ;;  %v2135_v12 = vsel %vm427_vm2, 0.0, %v1954_v11  ;;  %v2137_v14 = vsel %vm428_vm3, 0.0, %v1954_v11 }
 0x181   :  { %v121_v46 = vmul.f32 %v1786_v45, %v2095_v13  ;;  %v136_v50 = vadd.f32 %v1451_v48, %v128_v47 }
 0x183   :  { %v129_v49 = vmul.f32 %v1450_v44, %v121_v46 }
 0x185   :  { %v137_v51 = vadd.f32 %v1451_v48, %v129_v49 }
 0x187   :  { %v138_v52 = vpack.c.bf16 %v137_v51, %v136_v50 }
 0x189   :  { %332 = vmatmul.mubr.bf16.vlgmr.msra.gmra.mrb[0].mxu0 %v138_v52  ;;  %1600 = vmatmul.mubr.bf16.vlgmr.msra.gmra.mrb[0].mxu1 %v138_v52 }
 0x18a   :  { %1605 = vmatprep.mubr.msk.bf16.mxu1 %vm1953_vm0, %v1951_v4  ;;  %1629 = vmatprep.mubr.msk.bf16.mxu0 %vm1953_vm0, %v1951_v4 }
 0x25c   :  { %v333_v53 = vpop.f32.mrb[0].mxu0  ;;  %v376_v54 = vpop.f32.mrb[0].mxu1 }
 0x25d   :  { %v335_v55 = vpop.f32.mrb[1].mxu0  ;;  %v1601_v56 = vpop.f32.mrb[1].mxu1 }
 0x25e   :  { %v337_v57 = vpop.f32.mrb[2].mxu0  ;;  %v379_v58 = vpop.f32.mrb[2].mxu1 }
 0x25f   :  { %v383_v59 = vpack.c.bf16 %v337_v57, %v333_v53  ;;  %v2122_v60 = vpack.c.bf16 %v379_v58, %v376_v54  ;;  %v339_v61 = vpop.f32.mrb[3].mxu0  ;;  %v1602_v62 = vpop.f32.mrb[3].mxu1 }
 0x260   :  { %v384_v63 = vpack.c.bf16 %v339_v61, %v335_v55 }
 0x262   :  { %v436_v2 = vsel %vm431_vm1, %v384_v63, 0 }
 0x263   :  { %1604 = vmatpush3.bf16.xpose.msra.mxu1 %v436_v2 }
 0x264   :  { %1609 = vmatprep.subr.bf16.mxu1 %v1951_v4 }
 0x26a   :  { %1606 = vmatmul.mubr.msk.bf16.vlgmr.msra.gmra.mrb[4].mxu1 %vm431_vm1, %v383_v59 }
 0x26b   :  { %1610 = vmatpush3.bf16.msra.mxu1 %v2122_v60  ;;  %1611 = vmatprep.mubr.msk.bf16.mxu1 %vm1953_vm0, %v1951_v4 }
 0x26c   :  { %1615 = vmatprep.subr.bf16.mxu1 %v1951_v4 }
 0x33d   :  { %v472_v13 = vpop.f32.mrb[4].mxu1 }
 0x33e   :  { %v473_v15 = vadd.f32 %v472_v13, %v2135_v12  ;;  %v1607_v16 = vpop.f32.mrb[5].mxu1 }
 0x33f   :  { %v475_v17 = vpop.f32.mrb[6].mxu1 }
 0x340   :  { %v476_v18 = vadd.f32 %v475_v17, %v2137_v14  ;;  %v1608_v19 = vpop.f32.mrb[7].mxu1  ;;  %v480_v20 = vsel %vm479_vm4, %v473_v15, -inf }
 0x341   :  { %481 = vmax.xlane.f32.xlu0 %v480_v20 }
 0x342   :  { %v483_v21 = vsel %vm479_vm4, %v476_v18, -inf }
 0x343   :  { %484 = vmax.xlane.f32.xlu1 %v483_v21 }
 0x3ce   :  { %v482_v22 = vpop.xlane.xlu0 %481 }
 0x3cf   :  { %v486_v23 = vsub.f32 %v473_v15, %v482_v22 }
 0x3d0   :  { %v485_v24 = vpop.xlane.xlu1 %484 }
 0x3d1   :  { %v488_v25 = vmul.f32 1.442695, %v486_v23  ;;  %v487_v26 = vsub.f32 %v476_v18, %v485_v24 }
 0x3d3   :  { %1787 = vpow2.f32 %v488_v25  ;;  %v490_v27 = vmul.f32 1.442695, %v487_v26 }
 0x3d5   :  { %1789 = vpow2.f32 %v490_v27 }
 0x3dd   :  { %v1788_v28 = vpop.eup %1787 }
 0x3de   :  { %v492_v29 = vsel %vm479_vm4, %v1788_v28, 0.0 }
 0x3df   :  { %v1790_v31 = vpop.eup %1789  ;;  %493 = vadd.xlane.f32.xlu0 %v492_v29 }
 0x3e0   :  { %v495_v32 = vsel %vm479_vm4, %v1790_v31, 0.0 }
 0x3e1   :  { %496 = vadd.xlane.f32.xlu1 %v495_v32 }
 0x3f2   :  { %548 = vrot.lane.b32.xlu1 %v383_v59, %s1955_s1 }
 0x3f5   :  { %551 = vrot.lane.b32.xlu0 %v384_v63, %s1955_s1 }
 0x3f6   :  { %673 = vrot.lane.b32.xlu1 %v384_v63, %s1942_s27 }
 0x3f9   :  { %794 = vrot.lane.b32.xlu0 %v384_v63, %s1956_s2 }
 0x3fa   :  { %671 = vrot.lane.b32.xlu1 %v383_v59, %s1942_s27 }
 0x3fe   :  { %792 = vrot.lane.b32.xlu1 %v383_v59, %s1956_s2 }
 0x46c   :  { %v494_v33 = vpop.xlane.xlu0 %493 }
 0x46d   :  { %1791 = vrcp.f32 %v494_v33 }
 0x46e   :  { %v497_v34 = vpop.xlane.xlu1 %496 }
 0x46f   :  { %1793 = vrcp.f32 %v497_v34 }
 0x470   :  { %v552_v36 = vpop.permute.xlu0 %551 }
 0x471   :  { %v557_v45 = vsel %vm431_vm1, %v552_v36, 0 }
 0x472   :  { %v549_v35 = vpop.permute.xlu1 %548 }
 0x474   :  { %v795_v43 = vpop.permute.xlu0 %794 }
 0x475   :  { %v800_v47 = vsel %vm431_vm1, %v795_v43, 0 }
 0x476   :  { %v674_v37 = vpop.permute.xlu1 %673 }
 0x477   :  { %v1792_v38 = vpop.eup %1791  ;;  %v679_v39 = vsel %vm431_vm1, %v674_v37, 0 }
 0x478   :  { %1628 = vmatpush3.bf16.xpose.msra.mxu0 %v679_v39  ;;  %v500_v41 = vmul.f32 %v1792_v38, %v1788_v28 }
 0x479   :  { %v1794_v40 = vpop.eup %1793  ;;  %1639 = vmatprep.subr.bf16.mxu0 %v1951_v4 }
 0x47a   :  { %v501_v42 = vmul.f32 %v1794_v40, %v1790_v31  ;;  %v672_v46 = vpop.permute.xlu1 %671 }
 0x47c   :  { %v502_v44 = vpack.c.bf16 %v501_v42, %v500_v41 }
 0x47e   :  { %1612 = vmatmul.mubr.msk.bf16.vlgmr.msra.gmra.mrb[8].mxu1 %vm479_vm4, %v502_v44  ;;  %v793_v48 = vpop.permute.xlu1 %792 }
 0x47f   :  { %1616 = vmatpush3.bf16.xpose.msra.mxu1 %v557_v45  ;;  %1630 = vmatmul.mubr.msk.bf16.vlgmr.msra.gmra.mrb[4].mxu0 %vm431_vm1, %v672_v46 }
 0x480   :  { %1640 = vmatpush3.bf16.xpose.msra.mxu0 %v800_v47  ;;  %1617 = vmatprep.mubr.msk.bf16.mxu1 %vm1953_vm0, %v1951_v4 }
 0x481   :  { %1641 = vmatprep.mubr.msk.bf16.mxu0 %vm1953_vm0, %v1951_v4  ;;  %1621 = vmatprep.subr.bf16.mxu1 %v1951_v4 }
 0x482   :  { %1651 = vmatprep.subr.bf16.mxu0 %v1951_v4 }
 0x486   :  { %1618 = vmatmul.mubr.msk.bf16.vlgmr.msra.gmra.mrb[12].mxu1 %vm431_vm1, %v549_v35 }
 0x487   :  { %1642 = vmatmul.mubr.msk.bf16.vlgmr.msra.gmra.mrb[8].mxu0 %vm431_vm1, %v793_v48  ;;  %1623 = vmatprep.mubr.msk.bf16.mxu1 %vm1953_vm0, %v1951_v4 }
 0x488   :  { %1667 = vmatprep.mubr.msk.bf16.mxu0 %vm1953_vm0, %v1951_v4 }
 0x551   :  { %v2169_v49 = vpop.f32.mrb[8].mxu1 }
 0x552   :  { %v1613_v50 = vpop.f32.mrb[9].mxu1  ;;  %v715_v51 = vpop.f32.mrb[4].mxu0 }
 0x553   :  { %v2171_v52 = vpop.f32.mrb[10].mxu1  ;;  %v1631_v53 = vpop.f32.mrb[5].mxu0  ;;  %v716_v2 = vadd.f32 %v715_v51, %v2135_v12 }
 0x554   :  { %v1614_v54 = vpop.f32.mrb[11].mxu1  ;;  %v718_v55 = vpop.f32.mrb[6].mxu0 }
 0x555   :  { %v1632_v56 = vpop.f32.mrb[7].mxu0  ;;  %v719_v13 = vadd.f32 %v718_v55, %v2137_v14  ;;  %v722_v15 = vsel %vm479_vm4, %v716_v2, -inf }
 0x557   :  { %v725_v18 = vsel %vm479_vm4, %v719_v13, -inf }
 0x559   :  { %v593_v57 = vpop.f32.mrb[12].mxu1 }
 0x55a   :  { %v594_v58 = vadd.f32 %v593_v57, %v2135_v12  ;;  %v1619_v59 = vpop.f32.mrb[13].mxu1  ;;  %v836_v61 = vpop.f32.mrb[8].mxu0 }
 0x55b   :  { %v596_v62 = vpop.f32.mrb[14].mxu1  ;;  %v1643_v63 = vpop.f32.mrb[9].mxu0  ;;  %v837_v17 = vadd.f32 %v836_v61, %v2135_v12 }
 0x55c   :  { %v597_v3 = vadd.f32 %v596_v62, %v2137_v14  ;;  %v1620_v6 = vpop.f32.mrb[15].mxu1  ;;  %v839_v7 = vpop.f32.mrb[10].mxu0  ;;  %v600_v8 = vsel %vm479_vm4, %v594_v58, -inf }
 0x55d   :  { %v1644_v9 = vpop.f32.mrb[11].mxu0  ;;  %601 = vmax.xlane.f32.xlu0 %v600_v8  ;;  %v840_v10 = vadd.f32 %v839_v7, %v2137_v14  ;;  %v843_v19 = vsel %vm479_vm4, %v837_v17, -inf }
 0x55e   :  { %v603_v11 = vsel %vm479_vm4, %v597_v3, -inf }
 0x55f   :  { %604 = vmax.xlane.f32.xlu1 %v603_v11  ;;  %v846_v16 = vsel %vm479_vm4, %v840_v10, -inf }
 0x561   :  { %723 = vmax.xlane.f32.xlu0 %v722_v15 }
 0x563   :  { %847 = vmax.xlane.f32.xlu1 %v846_v16 }
 0x565   :  { %726 = vmax.xlane.f32.xlu0 %v725_v18  ;;  %v1736_v18 = vld [vmem:[#allocation5 + $0x8] sm:$0xff]  }
 0x569   :  { %844 = vmax.xlane.f32.xlu0 %v843_v19  ;;  %v1737_v19 = vld [vmem:[#allocation5 + $0x10] sm:$0xff]  }
 0x5ea   :  { %v602_v20 = vpop.xlane.xlu0 %601 }
 0x5eb   :  { %v606_v28 = vsub.f32 %v594_v58, %v602_v20  ;;  %v1738_v20 = vld [vmem:[#allocation5 + $0x18] sm:$0xff]  }
 0x5ec   :  { %v605_v21 = vpop.xlane.xlu1 %604 }
 0x5ed   :  { %v607_v29 = vsub.f32 %v597_v3, %v605_v21  ;;  %v608_v34 = vmul.f32 1.442695, %v606_v28  ;;  %v1739_v21 = vld [vmem:[#allocation5 + $0x20] sm:$0xff]  }
 0x5ee   :  { %v724_v22 = vpop.xlane.xlu0 %723 }
 0x5ef   :  { %v728_v23 = vsub.f32 %v716_v2, %v724_v22  ;;  %v610_v35 = vmul.f32 1.442695, %v607_v29  ;;  %v1742_v29 = vld [vmem:[#allocation5 + $0x38] sm:$0xff]  }
 0x5f0   :  { %v848_v24 = vpop.xlane.xlu1 %847 }
 0x5f1   :  { %v730_v14 = vmul.f32 1.442695, %v728_v23  ;;  %v850_v25 = vsub.f32 %v840_v10, %v848_v24  ;;  %v1740_v23 = vld [vmem:[#allocation5 + $0x28] sm:$0xff]  }
 0x5f2   :  { %v727_v26 = vpop.xlane.xlu0 %726 }
 0x5f3   :  { %1795 = vpow2.f32 %v730_v14  ;;  %v729_v27 = vsub.f32 %v719_v13, %v727_v26  ;;  %v853_v31 = vmul.f32 1.442695, %v850_v25  ;;  %v1741_v26 = vld [vmem:[#allocation5 + $0x30] sm:$0xff]  }
 0x5f5   :  { %v732_v12 = vmul.f32 1.442695, %v729_v27 }
 0x5f6   :  { %v845_v32 = vpop.xlane.xlu0 %844 }
 0x5f7   :  { %1797 = vpow2.f32 %v732_v12  ;;  %v849_v33 = vsub.f32 %v837_v17, %v845_v32  ;;  %v1735_v17 = vld [vmem:[#allocation5] sm:$0xff]  }
 0x5f8   :  { %1799 = vpow2.f32 %v853_v31  ;;  %1652 = vmatpush3.bf16.msra.mxu0 %v1735_v17  ;;  %v1760_v17 = vld [vmem:[#allocation7 + $0x54] ss:$8 sps:$4 sm:$0xff]  }
 0x5f9   :  { %v851_v36 = vmul.f32 1.442695, %v849_v33  ;;  %1653 = vmatprep.subr.bf16.mxu0 %v1951_v4 }
 0x5fb   :  { %1801 = vpow2.f32 %v851_v36 }
 0x5fc   :  { %1803 = vpow2.f32 %v608_v34  ;;  %1654 = vmatpush3.bf16.msra.mxu0 %v1736_v18  ;;  %v1758_v18 = vld [vmem:[#allocation7 + $0x50] ss:$8 sps:$4 sm:$0xff]  }
 0x5fd   :  { %v1796_v37 = vpop.eup %1795  ;;  %1805 = vpow2.f32 %v610_v35  ;;  %1655 = vmatprep.subr.bf16.mxu0 %v1951_v4 }
 0x5fe   :  { %v734_v38 = vsel %vm479_vm4, %v1796_v37, 0.0 }
 0x5ff   :  { %735 = vadd.xlane.f32.xlu0 %v734_v38 }
 0x600   :  { %1656 = vmatpush3.bf16.msra.mxu0 %v1737_v19  ;;  %v1763_v19 = vld [vmem:[#allocation7 + $0x64] ss:$8 sps:$4 sm:$0xff]  }
 0x601   :  { %v1798_v39 = vpop.eup %1797  ;;  %1657 = vmatprep.subr.bf16.mxu0 %v1951_v4 }
 0x602   :  { %v737_v40 = vsel %vm479_vm4, %v1798_v39, 0.0  ;;  %v1800_v41 = vpop.eup %1799 }
 0x603   :  { %738 = vadd.xlane.f32.xlu1 %v737_v40  ;;  %v858_v45 = vsel %vm479_vm4, %v1800_v41, 0.0 }
 0x604   :  { %1658 = vmatpush3.bf16.msra.mxu0 %v1738_v20  ;;  %v1761_v20 = vld [vmem:[#allocation7 + $0x60] ss:$8 sps:$4 sm:$0xff]  }
 0x605   :  { %v1802_v42 = vpop.eup %1801  ;;  %1659 = vmatprep.subr.bf16.mxu0 %v1951_v4 }
 0x606   :  { %v1804_v43 = vpop.eup %1803  ;;  %v855_v44 = vsel %vm479_vm4, %v1802_v42, 0.0 }
 0x607   :  { %v1806_v46 = vpop.eup %1805  ;;  %856 = vadd.xlane.f32.xlu0 %v855_v44  ;;  %859 = vadd.xlane.f32.xlu1 %v858_v45  ;;  %v612_v47 = vsel %vm479_vm4, %v1804_v43, 0.0 }
 0x608   :  { %v615_v48 = vsel %vm479_vm4, %v1806_v46, 0.0  ;;  %1660 = vmatpush3.bf16.msra.mxu0 %v1739_v21  ;;  %v1766_v21 = vld [vmem:[#allocation7 + $0x74] ss:$8 sps:$4 sm:$0xff]  }
 0x609   :  { %1661 = vmatprep.subr.bf16.mxu0 %v1951_v4 }
 0x60b   :  { %613 = vadd.xlane.f32.xlu0 %v612_v47  ;;  %616 = vadd.xlane.f32.xlu1 %v615_v48 }
 0x60c   :  { %1662 = vmatpush3.bf16.msra.mxu0 %v1740_v23  ;;  %v1768_v23 = vld [vmem:[#allocation8] sm:$0xff]  }
 0x60d   :  { %1663 = vmatprep.subr.bf16.mxu0 %v1951_v4 }
 0x610   :  { %1664 = vmatpush3.bf16.msra.mxu0 %v1741_v26  ;;  %v1772_v26 = vld [vmem:[#allocation8 + $0x10] sm:$0xff]  }
 0x611   :  { %1665 = vmatprep.subr.bf16.mxu0 %v1951_v4 }
 0x614   :  { %1666 = vmatpush3.bf16.msra.mxu0 %v1742_v29  ;;  %v1775_v29 = vld [vmem:[#allocation8 + $0x60] sm:$0xff]  }
 0x61c   :  { %745 = vrot.lane.b32.xlu1 %v2122_v60, %s1942_s27 }
 0x620   :  { %866 = vrot.lane.b32.xlu1 %v2122_v60, %s1956_s2 }
 0x621   :  { %624 = vrot.lane.b32.xlu0 %v2122_v60, %s1955_s1 }
 0x68c   :  { %v736_v50 = vpop.xlane.xlu0 %735 }
 0x690   :  { %v739_v51 = vpop.xlane.xlu1 %738 }
 0x694   :  { %v857_v53 = vpop.xlane.xlu0 %856  ;;  %v860_v54 = vpop.xlane.xlu1 %859 }
 0x698   :  { %v614_v55 = vpop.xlane.xlu0 %613  ;;  %v617_v56 = vpop.xlane.xlu1 %616 }
 0x699   :  { %1807 = vrcp.f32 %v614_v55 }
 0x69a   :  { %1809 = vrcp.f32 %v617_v56 }
 0x69b   :  { %1811 = vrcp.f32 %v739_v51 }
 0x69c   :  { %v625_v57 = vpop.permute.xlu0 %624  ;;  %1813 = vrcp.f32 %v736_v50  ;;  %v746_v2 = vpop.permute.xlu1 %745 }
 0x69d   :  { %1622 = vmatpush3.bf16.msra.mxu1 %v625_v57  ;;  %1815 = vrcp.f32 %v857_v53 }
 0x69e   :  { %1633 = vmatprep.subr.bf16.mxu1 %v1951_v4  ;;  %1817 = vrcp.f32 %v860_v54 }
 0x6a0   :  { %v867_v11 = vpop.permute.xlu1 %866 }
 0x6a3   :  { %v1808_v58 = vpop.eup %1807 }
 0x6a4   :  { %v1810_v59 = vpop.eup %1809  ;;  %v620_v61 = vmul.f32 %v1808_v58, %v1804_v43 }
 0x6a5   :  { %v621_v62 = vmul.f32 %v1810_v59, %v1806_v46  ;;  %v1812_v63 = vpop.eup %1811 }
 0x6a6   :  { %v1814_v3 = vpop.eup %1813  ;;  %v743_v6 = vmul.f32 %v1812_v63, %v1798_v39 }
 0x6a7   :  { %v622_v60 = vpack.c.bf16 %v621_v62, %v620_v61  ;;  %v742_v7 = vmul.f32 %v1814_v3, %v1796_v37  ;;  %v1816_v8 = vpop.eup %1815  ;;  %v1745_v61 = vld [vmem:[#allocation7 + $0x4] ss:$8 sps:$4 sm:$0xff]   ;;  %v1748_v62 = vld [vmem:[#allocation7 + $0x14] ss:$8 sps:$4 sm:$0xff]  }
 0x6a8   :  { %v1818_v10 = vpop.eup %1817  ;;  %v863_v13 = vmul.f32 %v1816_v8, %v1802_v42 }
 0x6a9   :  { %1624 = vmatmul.mubr.msk.bf16.vlgmr.msra.gmra.mrb[16].mxu1 %vm479_vm4, %v622_v60  ;;  %v744_v9 = vpack.c.bf16 %v743_v6, %v742_v7  ;;  %v864_v15 = vmul.f32 %v1818_v10, %v1800_v41  ;;  %v1746_v60 = vld [vmem:[#allocation7 + $0x10] ss:$8 sps:$4 sm:$0xff]   ;;  %v1749_v10 = vld [vmem:[#allocation7 + $0x20] ss:$8 sps:$4 sm:$0xff]  }
 0x6aa   :  { %1634 = vmatpush3.bf16.msra.mxu1 %v746_v2  ;;  %1635 = vmatprep.mubr.msk.bf16.mxu1 %vm1953_vm0, %v1951_v4 }
 0x6ab   :  { %1645 = vmatprep.subr.bf16.mxu1 %v1951_v4  ;;  %v865_v16 = vpack.c.bf16 %v864_v15, %v863_v13  ;;  %v1752_v13 = vld [vmem:[#allocation7 + $0x30] ss:$8 sps:$4 sm:$0xff]   ;;  %v1757_v15 = vld [vmem:[#allocation7 + $0x44] ss:$8 sps:$4 sm:$0xff]  }
 0x6b1   :  { %1636 = vmatmul.mubr.msk.bf16.vlgmr.msra.gmra.mrb[20].mxu1 %vm479_vm4, %v744_v9  ;;  %v1751_v9 = vld [vmem:[#allocation7 + $0x24] ss:$8 sps:$4 sm:$0xff]  }
 0x6b2   :  { %1646 = vmatpush3.bf16.msra.mxu1 %v867_v11  ;;  %1647 = vmatprep.mubr.msk.bf16.mxu1 %vm1953_vm0, %v1951_v4  ;;  %v1754_v11 = vld [vmem:[#allocation7 + $0x34] ss:$8 sps:$4 sm:$0xff]  }
 0x6b3   :  { %1202 = vmatprep.subr.bf16.mxu1 %v1745_v61 }
 0x6b9   :  { %1648 = vmatmul.mubr.msk.bf16.vlgmr.msra.gmra.mrb[24].mxu1 %vm479_vm4, %v865_v16  ;;  %v1755_v16 = vld [vmem:[#allocation7 + $0x40] ss:$8 sps:$4 sm:$0xff]  }
 0x6ba   :  { %1234 = vmatprep.mubr.bf16.mxu1 %v1952_v30 }
 0x77c   :  { %v664_v22 = vpop.f32.mrb[16].mxu1 }
 0x77d   :  { %v1625_v30 = vpop.f32.mrb[17].mxu1 }
 0x77e   :  { %v667_v24 = vpop.f32.mrb[18].mxu1  ;;  %v1767_v30 = vld [vmem:[#allocation8 + $0x40] sm:$0xff]  }
 0x77f   :  { %v1688_v14 = vpack.i.bf16 %v667_v24, %v664_v22  ;;  %v1626_v25 = vpop.f32.mrb[19].mxu1  ;;  %v1764_v22 = vld [vmem:[#allocation7 + $0x70] ss:$8 sps:$4 sm:$0xff]   ;;  %v1769_v24 = vld [vmem:[#allocation8 + $0x48] sm:$0xff]   ;;  %1561 = vmatprep.subr.bf16.mxu0 %v1767_v30 }
 0x780   :  { %v1771_v25 = vld [vmem:[#allocation8 + $0x50] sm:$0xff]  }
 0x781   :  { %1689 = vrot.lane.b32.xlu1 %v1688_v14, %s1956_s2  ;;  %v1770_v14 = vld [vmem:[#allocation8 + $0x8] sm:$0xff]  }
 0x784   :  { %v785_v27 = vpop.f32.mrb[20].mxu1 }
 0x785   :  { %v1637_v28 = vpop.f32.mrb[21].mxu1 }
 0x786   :  { %v788_v31 = vpop.f32.mrb[22].mxu1  ;;  %v1774_v28 = vld [vmem:[#allocation8 + $0x18] sm:$0xff]  }
 0x787   :  { %v1693_v12 = vpack.i.bf16 %v788_v31, %v785_v27  ;;  %v1638_v32 = vpop.f32.mrb[23].mxu1  ;;  %v1773_v27 = vld [vmem:[#allocation8 + $0x58] sm:$0xff]   ;;  %v1776_v31 = vld [vmem:[#allocation8 + $0x20] sm:$0xff]  }
 0x789   :  { %1694 = vrot.lane.b32.xlu0 %v1693_v12, %s1942_s27  ;;  %v1777_v12 = vld [vmem:[#allocation8 + $0x68] sm:$0xff]  }
 0x78c   :  { %v906_v33 = vpop.f32.mrb[24].mxu1 }
 0x78d   :  { %v1649_v34 = vpop.f32.mrb[25].mxu1 }
 0x78e   :  { %v909_v35 = vpop.f32.mrb[26].mxu1 }
 0x78f   :  { %v1698_v36 = vpack.i.bf16 %v909_v35, %v906_v33  ;;  %v1650_v37 = vpop.f32.mrb[27].mxu1 }
 0x791   :  { %1699 = vrot.lane.b32.xlu1 %v1698_v36, %s1955_s1 }
 0x7f3   :  { %v1690_v38 = vpop.permute.xlu1 %1689 }
 0x7f4   :  { %v1692_v40 = vunpack.i.h.bf16 %v1690_v38  ;;  %v1691_v41 = vunpack.i.l.bf16 %v1690_v38 }
 0x7f6   :  { %v938_v44 = vsel %vm431_vm1, %v2171_v52, %v1692_v40  ;;  %v937_v45 = vsel %vm431_vm1, %v2169_v49, %v1691_v41  ;;  %v1743_v52 = vld [vmem:[#allocation7] ss:$8 sps:$4 sm:$0xff]  }
 0x7f7   :  { %1203 = vmatpush1.bf16.msra.mxu1 %v1743_v52  ;;  %v1492_v40 = vld [vmem:[%s2270_s3] ss:$0 sm:$0xff] }
 0x7f8   :  { %1204 = vmatprep.subr.bf16.mxu1 %v1748_v62 }
 0x7fb   :  { %v1695_v39 = vpop.permute.xlu0 %1694  ;;  %1205 = vmatpush1.bf16.msra.mxu1 %v1746_v60 }
 0x7fc   :  { %v1697_v4 = vunpack.i.h.bf16 %v1695_v39  ;;  %v1696_v42 = vunpack.i.l.bf16 %v1695_v39  ;;  %1206 = vmatprep.subr.bf16.mxu1 %v1751_v9 }
 0x7fe   :  { %v941_v48 = vsel %vm939_vm5, %v938_v44, %v1697_v4  ;;  %v940_v50 = vsel %vm939_vm5, %v937_v45, %v1696_v42 }
 0x7ff   :  { %1207 = vmatpush1.bf16.msra.mxu1 %v1749_v10 }
 0x800   :  { %1208 = vmatprep.subr.bf16.mxu1 %v1754_v11 }
 0x803   :  { %v1700_v43 = vpop.permute.xlu1 %1699  ;;  %1209 = vmatpush1.bf16.msra.mxu1 %v1752_v13 }
 0x804   :  { %v1702_v46 = vunpack.i.h.bf16 %v1700_v43  ;;  %v1701_v47 = vunpack.i.l.bf16 %v1700_v43  ;;  %1210 = vmatprep.subr.bf16.mxu1 %v1757_v15  ;;  %v1493_v43 = vld [vmem:[%s2271_s4] ss:$0 sm:$0xff] }
 0x806   :  { %v944_v51 = vsel %vm942_vm6, %v941_v48, %v1702_v46  ;;  %v943_v53 = vsel %vm942_vm6, %v940_v50, %v1701_v47  ;;  %v1778_v48 = vld [vmem:[#allocation8 + $0x28] sm:$0xff]   ;;  %v1779_v50 = vld [vmem:[#allocation8 + $0x70] sm:$0xff]  }
 0x807   :  { %v945_v54 = vpack.c.bf16 %v944_v51, %v943_v53  ;;  %1211 = vmatpush1.bf16.msra.mxu1 %v1755_v16  ;;  %v1780_v51 = vld [vmem:[#allocation8 + $0x30] sm:$0xff]   ;;  %v1781_v53 = vld [vmem:[#allocation8 + $0x78] sm:$0xff]  }
 0x808   :  { %1212 = vmatprep.subr.bf16.mxu1 %v1760_v17 }
 0x809   :  { %1668 = vmatmul.mubr.bf16.vlgmr.msra.gmra.mrb[12].mxu0 %v945_v54  ;;  %v1782_v54 = vld [vmem:[#allocation8 + $0x38] sm:$0xff]  }
 0x80a   :  { %1562 = vmatpush3.bf16.msra.mxu0 %v1768_v23 }
 0x80b   :  { %1213 = vmatpush1.bf16.msra.mxu1 %v1758_v18  ;;  %1563 = vmatprep.subr.bf16.mxu0 %v1769_v24 }
 0x80c   :  { %1214 = vmatprep.subr.bf16.mxu1 %v1763_v19 }
 0x80e   :  { %1564 = vmatpush3.bf16.msra.mxu0 %v1770_v14 }
 0x80f   :  { %1215 = vmatpush1.bf16.msra.mxu1 %v1761_v20  ;;  %1565 = vmatprep.subr.bf16.mxu0 %v1771_v25 }
 0x810   :  { %1216 = vmatprep.subr.bf16.mxu1 %v1766_v21 }
 0x812   :  { %1566 = vmatpush3.bf16.msra.mxu0 %v1772_v26 }
 0x813   :  { %1217 = vmatpush1.bf16.msra.mxu1 %v1764_v22  ;;  %1567 = vmatprep.subr.bf16.mxu0 %v1773_v27 }
 0x816   :  { %1568 = vmatpush3.bf16.msra.mxu0 %v1774_v28 }
 0x817   :  { %1569 = vmatprep.subr.bf16.mxu0 %v1775_v29 }
 0x81a   :  { %1570 = vmatpush3.bf16.msra.mxu0 %v1776_v31 }
 0x81b   :  { %1571 = vmatprep.subr.bf16.mxu0 %v1777_v12 }
 0x81e   :  { %1572 = vmatpush3.bf16.msra.mxu0 %v1778_v48 }
 0x81f   :  { %1573 = vmatprep.subr.bf16.mxu0 %v1779_v50 }
 0x822   :  { %1574 = vmatpush3.bf16.msra.mxu0 %v1780_v51 }
 0x823   :  { %1575 = vmatprep.subr.bf16.mxu0 %v1781_v53 }
 0x826   :  { %1576 = vmatpush3.bf16.msra.mxu0 %v1782_v54 }
 0x8dc   :  { %v1044_v55 = vpop.f32.mrb[12].mxu0 }
 0x8dd   :  { %v2222_v56 = vadd.f32 %v1044_v55, %v2078_v0  ;;  %v1669_v57 = vpop.f32.mrb[13].mxu0  ;;  %v1114_v55 = vsub.s32 0, %v2131_v5 }
 0x8de   :  { %v1047_v58 = vpop.f32.mrb[14].mxu0  ;;  %v1110_v57 = vld [vmem:[%s2275_s8] sm:$0x3] }
 0x8df   :  { %v2225_v59 = vadd.f32 %v1047_v58, %v2083_v1  ;;  %1055 = vadd.xlane.f32.xlu0 %v2222_v56  ;;  %v1670_v49 = vpop.f32.mrb[15].mxu0  ;;  %v1118_v58 = vsub.s32 1, %v2131_v5  ;;  %v1510_v5 = vld [vmem:[%s2277_s10] ss:$0 sm:$0xff] }
 0x8e0   :  { %v1115_v49 = vrot.slane %v1110_v57, %v1114_v55 }
 0x8e1   :  { %1057 = vadd.xlane.f32.xlu1 %v2225_v59  ;;  %v1119_v52 = vrot.slane %v1110_v57, %v1118_v58 }
 0x96c   :  { %v1056_v0 = vpop.xlane.xlu0 %1055 }
 0x96d   :  { %v1059_v63 = vmul.f32 0.0078125, %v1056_v0 }
 0x96e   :  { %v1058_v2 = vpop.xlane.xlu1 %1057 }
 0x96f   :  { %v1061_v3 = vsub.f32 %v2222_v56, %v1059_v63  ;;  %v1060_v1 = vmul.f32 0.0078125, %v1058_v2 }
 0x971   :  { %v2231_v6 = vsub.f32 %v2225_v59, %v1060_v1  ;;  %v1063_v7 = vmul.f32 %v1061_v3, %v1061_v3 }
 0x973   :  { %1065 = vadd.xlane.f32.xlu0 %v1063_v7  ;;  %v1064_v8 = vmul.f32 %v2231_v6, %v2231_v6 }
 0x977   :  { %1067 = vadd.xlane.f32.xlu0 %v1064_v8 }
 0xa00   :  { %v1066_v32 = vpop.xlane.xlu0 %1065 }
 0xa01   :  { %v1069_v33 = vmul.f32 0.0078125, %v1066_v32 }
 0xa03   :  { %v1071_v34 = vadd.f32 1e-05, %v1069_v33 }
 0xa04   :  { %v1068_v35 = vpop.xlane.xlu0 %1067 }
 0xa05   :  { %1819 = vrsqrt.f32 %v1071_v34  ;;  %v1070_v36 = vmul.f32 0.0078125, %v1068_v35 }
 0xa07   :  { %v1072_v37 = vadd.f32 1e-05, %v1070_v36 }
 0xa09   :  { %1821 = vrsqrt.f32 %v1072_v37 }
 0xa0f   :  { %v1820_v38 = vpop.eup %1819 }
 0xa10   :  { %v1075_v39 = vmul.f32 %v1820_v38, %v1061_v3 }
 0xa12   :  { %v1083_v42 = vmul.f32 %v1492_v40, %v1075_v39 }
 0xa13   :  { %v1822_v41 = vpop.eup %1821 }
 0xa14   :  { %v1076_v4 = vmul.f32 %v1822_v41, %v2231_v6  ;;  %v1091_v45 = vadd.f32 %v1493_v43, %v1083_v42 }
 0xa16   :  { %v1084_v44 = vmul.f32 %v1492_v40, %v1076_v4 }
 0xa18   :  { %v1092_v46 = vadd.f32 %v1493_v43, %v1084_v44 }
 0xa1a   :  { %v1093_v47 = vpack.c.bf16 %v1092_v46, %v1091_v45 }
 0xa1c   :  { %1235 = vmatmul.mubr.bf16.vlgmr.msra.gmra.mrb[28].mxu1 %v1093_v47 }
 0xaef   :  { %v1236_v61 = vpop.f32.mrb[28].mxu1 }
 0xaf0   :  { %v1237_v62 = vadd.f32 %v1236_v61, %v1115_v49  ;;  %v1238_v60 = vpop.f32.mrb[29].mxu1 }
 0xaf1   :  { %v1239_v0 = vadd.f32 %v1238_v60, %v1119_v52  ;;  %v1240_v63 = vpop.f32.mrb[30].mxu1 }
 0xaf2   :  { %v1241_v2 = vadd.f32 %v1240_v63, %v1115_v49  ;;  %v1242_v3 = vpop.f32.mrb[31].mxu1  ;;  %v1245_v6 = vmax.f32 %v1237_v62, 0.0 }
 0xaf3   :  { %v1243_v1 = vadd.f32 %v1242_v3, %v1119_v52  ;;  %v1246_v8 = vmax.f32 %v1239_v0, 0.0 }
 0xaf4   :  { %v1247_v7 = vmax.f32 %v1241_v2, 0.0 }
 0xaf5   :  { %v1248_v9 = vmax.f32 %v1243_v1, 0.0 }
 0xaf6   :  { %v1249_v10 = vpack.c.bf16 %v1247_v7, %v1245_v6 }
 0xaf7   :  { %v1250_v11 = vpack.c.bf16 %v1248_v9, %v1246_v8 }
 0xaf9   :  { %1418 = vmatprep.mubr.bf16.mxu0 %v1250_v11 }
 0xafa   :  { %1419 = vmatmul.mubr.bf16.vlgmr.msra.gmra.mrb[16].mxu0 %v1249_v10 }
 0xbcd   :  { %v1577_v13 = vpop.f32.mrb[16].mxu0 }
 0xbce   :  { %v1578_v15 = vpop.f32.mrb[17].mxu0 }
 0xbcf   :  { %v1579_v16 = vadd.f32 %v1578_v15, %v1577_v13  ;;  %v1580_v17 = vpop.f32.mrb[18].mxu0 }
 0xbd0   :  { %v1581_v18 = vpop.f32.mrb[19].mxu0 }
 0xbd1   :  { %v1421_v19 = vadd.f32 %v1579_v16, %v1510_v5  ;;  %v1582_v20 = vadd.f32 %v1581_v18, %v1580_v17 }
 0xbd3   :  { %v1427_v21 = vadd.f32 %v1421_v19, %v2222_v56  ;;  %v1424_v22 = vadd.f32 %v1582_v20, %v1510_v5 }
 0xbd5   :  { %1429 = vst [vmem:[#allocation10] sm:$0xff] %v1427_v21  ;;  %v1428_v30 = vadd.f32 %v1424_v22, %v2225_v59 }
 0xbd7   :  { %1430 = vst [vmem:[#allocation10 + $0x8] sm:$0xff] %v1428_v30 }
 0xbd8   :  { %1922 = shalt.err (!%p1919_p8)
}
 0xbd9   :  { %s1923_s30 = scalar_lea.hbm %s2278_s11, 256 }
 0xbda   :  { %p1924_p9 = scmp.ne.s32.totalorder %s2278_s11, %s1923_s30  ;;  %p1927_p10 = scmp.lt.u32.totalorder %s1923_s30, %s2278_s11 }
 0xbdc   :  { %p1929_p11 = pnand %p1927_p10, %p1924_p9 }
 0xbde   :  { %1932 = shalt.err (!%p1929_p11)
}
 0xbdf   :  { %1442 = dma.vmem_to_hbm [thread:$0]  %s1437_s24, 256, %s2278_s11, [#allocation4], %s1948_s5, %s1948_s5, %s1949_s13  }
 0xbe0   :  { %1939 = dma.done.wait [#allocation4], 256  }
 0xbe1   :  { %1940 = vsyncadd [#allocation4], 4294967040 }
 0xbe2   :  { %1446 = vsyncpa [#allocation3], 1 }
 0xbe3   :  { %1447 = vsyncpa [#allocation6], 1 }
 0xbe4   :  { %1448 = vsyncpa [#allocation9], 1 }
 0xbe5   :  { %1449 = vsyncpa [#allocation4], 1 }

</bundles_post_ra>
